<compile_context>
chip_gen: v6e
topology: v6e:2x2x1
jax: 0.10.0
libtpu: 0.0.40
codegen_flags: <defaults>
</compile_context>

<pallas_src>
import functools
import math

import jax
import jax.numpy as jnp
from jax.experimental import pallas as pl
from jax.experimental.pallas import tpu as pltpu

NEG_MASK = -9000000000000000.0  # same masking constant as the PyTorch module


# ---------------------------------------------------------------------------
# Pallas kernel: multi-head GraphAttentionLayer over a block of G slabs.
# Grid = (num_chunks,); each step handles G = (B*T)/num_chunks slabs, all heads.
# ---------------------------------------------------------------------------
def gat_kernel(x_ref, bias_ref, w_ref, wa_ref, o_ref, *, nheads, nout, alpha, concat):
    """
    x_ref    : (G, N, F)        G graph-signal slabs (one per (batch, time) pair)
    bias_ref : (N, N)           additive adjacency mask: 0 where adj > 0 else -9e15
    w_ref    : (F, H*nout)      all heads' projection matrices, concatenated
    wa_ref   : (F, 2*H)         per head the two columns W@a1, W@a2 (scores folded in)
    o_ref    : (G, N, H*nout)
    """
    G, N, F = x_ref.shape
    xf = x_ref[...].reshape(G * N, F)

    # Single projection matmul for all slabs and all heads (MXU).
    wh = jnp.dot(xf, w_ref[...], preferred_element_type=jnp.float32)      # (G*N, H*nout)
    # Attention scores: Wh@a1 / Wh@a2 folded into the weights as x @ (W@a).
    sc = jnp.dot(xf, wa_ref[...], preferred_element_type=jnp.float32)     # (G*N, 2*H)

    bias = bias_ref[...][None]                                            # (1, N, N)
    col = jax.lax.broadcasted_iota(jnp.int32, (G, N, 2), 2)               # 0/1 along lanes

    outs = []
    for h in range(nheads):
        wh_h = wh[:, h * nout:(h + 1) * nout].reshape(G, N, nout)          # (G, N, nout)
        s1 = sc[:, 2 * h:2 * h + 1].reshape(G, N, 1)                       # Wh @ a1
        s2 = sc[:, 2 * h + 1:2 * h + 2].reshape(G, N, 1)                   # Wh @ a2

        # e[g, n, m] = s1[g, n] + s2[g, m], built on the MXU as [s1|1] @ [1|s2]^T
        # (avoids any sublane<->lane relayout of the per-node score vectors).
        lhs = jnp.where(col == 0, s1, 1.0)                                 # (G, N, 2)
        rhs = jnp.where(col == 0, 1.0, s2)                                 # (G, N, 2)
        e = jnp.einsum('gnc,gmc->gnm', lhs, rhs,
                       preferred_element_type=jnp.float32)                 # (G, N, N)

        e = jnp.where(e > 0, e, jnp.float32(alpha) * e)                    # LeakyReLU
        e = e + bias                                                       # adjacency mask

        # row-wise softmax over neighbours (last axis)
        e = e - jnp.max(e, axis=-1, keepdims=True)
        p = jnp.exp(e)
        inv = 1.0 / jnp.sum(p, axis=-1, keepdims=True)                     # (G, N, 1)
        att = p * inv

        # TODO(synk): F.dropout on `att` skipped (eval mode / deterministic kernel)

        hp = jnp.einsum('gnm,gmo->gno', att, wh_h,
                        preferred_element_type=jnp.float32)                # (G, N, nout)
        if concat:
            # ELU; clamp the inactive branch so it never produces inf.
            hp = jnp.where(hp > 0, hp, jnp.exp(jnp.minimum(hp, 0.0)) - 1.0)
        outs.append(hp)

    o_ref[...] = outs[0] if nheads == 1 else jnp.concatenate(outs, axis=-1)


# ---------------------------------------------------------------------------
# Wrapper helpers
# ---------------------------------------------------------------------------
def _fold_params(W, a):
    """W: (H, Fin, Fout), a: (H, 2*Fout, 1) -> W_cat (Fin, H*Fout), Wa_cat (Fin, 2*H)."""
    H, Fin, Fout = W.shape
    W_cat = jnp.transpose(W, (1, 0, 2)).reshape(Fin, H * Fout)
    a_pair = jnp.concatenate([a[:, :Fout, :], a[:, Fout:, :]], axis=-1)    # (H, Fout, 2)
    Wa = jnp.einsum('hfo,hoc->hfc', W, a_pair,
                    precision=jax.lax.Precision.HIGHEST)                   # (H, Fin, 2)
    Wa_cat = jnp.transpose(Wa, (1, 0, 2)).reshape(Fin, 2 * H)
    return W_cat, Wa_cat


def _pick_slabs_per_step(BT, N, vmem_budget_bytes=8 << 20):
    """Choose G: as many slabs per grid step as a conservative VMEM budget allows,
    while keeping >= 2 grid steps so both v7x TensorCores get work."""
    # ~4 live float32 (N, N) temporaries per slab inside the kernel
    g = max(1, min(BT, vmem_budget_bytes // (16 * N * N)))
    if g >= BT and BT % 2 == 0:
        g = BT // 2
    while BT % g:
        g -= 1
    return g


def gat_layer(x_flat, adj_bias, W, a, *, alpha, concat, slabs_per_step=None):
    """
    x_flat   : (BT, N, Fin)
    adj_bias : (N, N)  additive mask
    W        : (H, Fin, Fout);  a : (H, 2*Fout, 1)
    returns (BT, N, H*Fout)
    """
    BT, N, Fin = x_flat.shape
    H, _, Fout = W.shape
    W_cat, Wa_cat = _fold_params(W, a)
    G = slabs_per_step or _pick_slabs_per_step(BT, N)

    kernel = functools.partial(gat_kernel, nheads=H, nout=Fout,
                               alpha=alpha, concat=concat)
    return pl.pallas_call(
        kernel,
        out_shape=jax.ShapeDtypeStruct((BT, N, H * Fout), jnp.float32),
        grid=(BT // G,),
        in_specs=[
            pl.BlockSpec((G, N, Fin), lambda i: (i, 0, 0)),      # G slabs of x
            pl.BlockSpec((N, N), lambda i: (0, 0)),              # additive adjacency mask
            pl.BlockSpec((Fin, H * Fout), lambda i: (0, 0)),     # all heads' W
            pl.BlockSpec((Fin, 2 * H), lambda i: (0, 0)),        # all heads' W@a columns
        ],
        out_specs=pl.BlockSpec((G, N, H * Fout), lambda i: (i, 0, 0)),
        compiler_params=pltpu.CompilerParams(
            dimension_semantics=("parallel",),
            vmem_limit_bytes=32 * 1024 * 1024),
    )(x_flat, adj_bias, W_cat, Wa_cat)


def gat_forward(x, adj, params, *, alpha):
    """Full GAT.forward (dropout = identity / eval mode). Returns (B, N, nclass, T)."""
    B, N, Fin, T = x.shape
    # Single layout change at each boundary; both layers run in (B*T, N, F).
    x_flat = jnp.transpose(x, (0, 3, 1, 2)).reshape(B * T, N, Fin)
    adj_bias = jnp.where(adj > 0, jnp.float32(0.0), jnp.float32(NEG_MASK))

    x1 = gat_layer(x_flat, adj_bias, params["W_heads"], params["a_heads"],
                   alpha=alpha, concat=True)      # (BT, N, H*nhid)
    x3 = gat_layer(x1, adj_bias, params["W_out"], params["a_out"],
                   alpha=alpha, concat=False)     # (BT, N, nclass)

    nclass = params["W_out"].shape[2]
    return jnp.transpose(x3.reshape(B, T, N, nclass), (0, 2, 3, 1))


# ---------------------------------------------------------------------------
# Pure-JAX reference (faithful to the PyTorch module) for correctness check
# ---------------------------------------------------------------------------
def gat_layer_ref(x, adj, W, a, *, alpha, concat):
    H, _, out = W.shape
    Wh = jnp.einsum('bnft,hfo->hbtno', x, W)
    a1 = a[:, :out, 0]
    a2 = a[:, out:, 0]
    Wh1 = jnp.einsum('hbtno,ho->hbtn', Wh, a1)
    Wh2 = jnp.einsum('hbtno,ho->hbtn', Wh, a2)
    e = Wh1[..., :, None] + Wh2[..., None, :]
    e = jnp.where(e > 0, e, alpha * e)
    att = jnp.where(adj[None, None, None] > 0, e, NEG_MASK)
    att = jax.nn.softmax(att, axis=-1)
    hp = jnp.einsum('hbtnm,hbtmo->hbtno', att, Wh)
    if concat:
        hp = jnp.where(hp > 0, hp, jnp.exp(hp) - 1.0)
    return jnp.transpose(hp, (1, 3, 0, 4, 2))  # (B, N, H, out, T)


def gat_forward_ref(x, adj, params, *, alpha):
    B, N, _, T = x.shape
    x1 = gat_layer_ref(x, adj, params["W_heads"], params["a_heads"],
                       alpha=alpha, concat=True)
    H, nhid = params["W_heads"].shape[0], params["W_heads"].shape[2]
    x1 = x1.reshape(B, N, H * nhid, T)
    x3 = gat_layer_ref(x1, adj, params["W_out"], params["a_out"],
                       alpha=alpha, concat=False)
    return x3[:, :, 0]  # (B, N, nclass, T)


# ---------------------------------------------------------------------------
# Parameter init (xavier_uniform_, gain=1.414) - deterministic, in-script
# ---------------------------------------------------------------------------
def xavier_uniform(key, shape, gain=1.414):
    fan_in, fan_out = shape[-2], shape[-1]
    bound = gain * math.sqrt(6.0 / (fan_in + fan_out))
    return jax.random.uniform(key, shape, jnp.float32, -bound, bound)


if __name__ == "__main__":
    # small shapes consistent with the module's forward
    B, N, nfeat, T = 2, 16, 8, 4
    nhid, nclass, nheads = 16, 8, 2
    alpha = 0.2

    key = jax.random.PRNGKey(0)
    kx, kadj, kw, ka, kwo, kao = jax.random.split(key, 6)

    x = jax.random.normal(kx, (B, N, nfeat, T), jnp.float32)
    # symmetric 0/1 adjacency with self-loops
    adj_rand = jax.random.uniform(kadj, (N, N))
    adj = (adj_rand + adj_rand.T > 1.0).astype(jnp.float32)
    adj = jnp.maximum(adj, jnp.eye(N, dtype=jnp.float32))

    params = {
        "W_heads": jnp.stack([xavier_uniform(k, (nfeat, nhid))
                              for k in jax.random.split(kw, nheads)]),
        "a_heads": jnp.stack([xavier_uniform(k, (2 * nhid, 1))
                              for k in jax.random.split(ka, nheads)]),
        "W_out": xavier_uniform(kwo, (nhid * nheads, nclass))[None],   # (1, H*nhid, nclass)
        "a_out": xavier_uniform(kao, (2 * nclass, 1))[None],           # (1, 2*nclass, 1)
    }

    fwd = jax.jit(functools.partial(gat_forward, alpha=alpha))
    out = jax.block_until_ready(fwd(x, adj, params))
    assert out.shape == (B, N, nclass, T), out.shape

    ref = gat_forward_ref(x, adj, params, alpha=alpha)
    assert jnp.allclose(out, ref, atol=1e-4, rtol=1e-4), \
        float(jnp.max(jnp.abs(out - ref)))

    print("KERNEL_OK")
</pallas_src>

<mosaic_0001>
module attributes {stable_mosaic.version = 11 : i64} {
  func.func @gat_kernel(%arg0: i32, %arg1: memref<4x16x32xf32, #tpu.memory_space<vmem>>, %arg2: memref<16x16xf32, #tpu.memory_space<vmem>>, %arg3: memref<32x8xf32, #tpu.memory_space<vmem>>, %arg4: memref<32x2xf32, #tpu.memory_space<vmem>>, %arg5: memref<4x16x8xf32, #tpu.memory_space<vmem>>) attributes {dimension_semantics = [#tpu.dimension_semantics<parallel>], iteration_bounds = array<i64: 2>, scalar_prefetch = 0 : i64, scratch_operands = 0 : i64, tpu.core_type = #tpu.core_type<tc>, window_params = [{transform_indices = @transform_0, window_bounds = array<i64: 4, 16, 32>}, {pipeline_mode = #tpu.pipeline_mode<synchronous>, transform_indices = @transform_1, window_bounds = array<i64: 16, 16>}, {pipeline_mode = #tpu.pipeline_mode<synchronous>, transform_indices = @transform_2, window_bounds = array<i64: 32, 8>}, {pipeline_mode = #tpu.pipeline_mode<synchronous>, transform_indices = @transform_3, window_bounds = array<i64: 32, 2>}, {transform_indices = @transform_4, window_bounds = array<i64: 4, 16, 8>}]} {
    %c0 = arith.constant 0 : index
    %c0_0 = arith.constant 0 : index
    %c0_1 = arith.constant 0 : index
    %0 = vector.load %arg1[%c0, %c0_0, %c0_1] : memref<4x16x32xf32, #tpu.memory_space<vmem>>, vector<4x16x32xf32>
    %1 = vector.shape_cast %0 : vector<4x16x32xf32> to vector<64x32xf32>
    %c0_2 = arith.constant 0 : index
    %c0_3 = arith.constant 0 : index
    %2 = vector.load %arg3[%c0_2, %c0_3] : memref<32x8xf32, #tpu.memory_space<vmem>>, vector<32x8xf32>
    %cst = arith.constant dense<0.000000e+00> : vector<64x8xf32>
    %3 = tpu.matmul %1, %2, %cst {dimension_numbers = #tpu.dot_dimension_numbers<[1], [0], [0], [1], [0, 0, 1, 1], [], []>} : vector<64x32xf32>, vector<32x8xf32>, vector<64x8xf32> -> vector<64x8xf32>
    %c0_4 = arith.constant 0 : index
    %c0_5 = arith.constant 0 : index
    %4 = vector.load %arg4[%c0_4, %c0_5] : memref<32x2xf32, #tpu.memory_space<vmem>>, vector<32x2xf32>
    %cst_6 = arith.constant dense<0.000000e+00> : vector<64x2xf32>
    %5 = tpu.matmul %1, %4, %cst_6 {dimension_numbers = #tpu.dot_dimension_numbers<[1], [0], [0], [1], [0, 0, 1, 1], [], []>} : vector<64x32xf32>, vector<32x2xf32>, vector<64x2xf32> -> vector<64x2xf32>
    %c0_7 = arith.constant 0 : index
    %c0_8 = arith.constant 0 : index
    %6 = vector.load %arg2[%c0_7, %c0_8] : memref<16x16xf32, #tpu.memory_space<vmem>>, vector<16x16xf32>
    %7 = vector.shape_cast %6 : vector<16x16xf32> to vector<1x16x16xf32>
    %8 = tpu.iota {dimensions = array<i32: 2>} : vector<4x16x2xi32>
    %9 = vector.shape_cast %3 : vector<64x8xf32> to vector<4x16x8xf32>
    %10 = vector.extract_strided_slice %5 {offsets = [0, 0], sizes = [64, 1], strides = [1, 1]} : vector<64x2xf32> to vector<64x1xf32>
    %11 = vector.shape_cast %10 : vector<64x1xf32> to vector<4x16x1xf32>
    %12 = vector.extract_strided_slice %5 {offsets = [0, 1], sizes = [64, 1], strides = [1, 1]} : vector<64x2xf32> to vector<64x1xf32>
    %13 = vector.shape_cast %12 : vector<64x1xf32> to vector<4x16x1xf32>
    %c0_i32 = arith.constant 0 : i32
    %14 = vector.broadcast %c0_i32 : i32 to vector<4x16x2xi32>
    %15 = arith.cmpi eq, %8, %14 : vector<4x16x2xi32>
    %cst_9 = arith.constant 1.000000e+00 : f32
    %16 = vector.shape_cast %11 : vector<4x16x1xf32> to vector<4x16x1xf32>
    %17 = vector.broadcast %16 : vector<4x16x1xf32> to vector<4x16x2xf32>
    %18 = vector.broadcast %cst_9 : f32 to vector<4x16x2xf32>
    %19 = arith.select %15, %17, %18 : vector<4x16x2xi1>, vector<4x16x2xf32>
    %c0_i32_10 = arith.constant 0 : i32
    %20 = vector.broadcast %c0_i32_10 : i32 to vector<4x16x2xi32>
    %21 = arith.cmpi eq, %8, %20 : vector<4x16x2xi32>
    %cst_11 = arith.constant 1.000000e+00 : f32
    %22 = vector.broadcast %cst_11 : f32 to vector<4x16x2xf32>
    %23 = vector.shape_cast %13 : vector<4x16x1xf32> to vector<4x16x1xf32>
    %24 = vector.broadcast %23 : vector<4x16x1xf32> to vector<4x16x2xf32>
    %25 = arith.select %21, %22, %24 : vector<4x16x2xi1>, vector<4x16x2xf32>
    "tpu.trace_start"() <{level = 10 : i32, message = "gnc,gmc->gnm"}> : () -> ()
    %cst_12 = arith.constant dense<0.000000e+00> : vector<4x16x16xf32>
    %26 = tpu.matmul %19, %25, %cst_12 {dimension_numbers = #tpu.dot_dimension_numbers<[2], [2], [1], [1], [0, 0, 0, 1, 1, 1], [0], [0]>} : vector<4x16x2xf32>, vector<4x16x2xf32>, vector<4x16x16xf32> -> vector<4x16x16xf32>
    %cst_13 = arith.constant 0.000000e+00 : f32
    "tpu.trace_stop"() : () -> ()
    %27 = vector.broadcast %cst_13 : f32 to vector<4x16x16xf32>
    %28 = arith.cmpf ogt, %26, %27 : vector<4x16x16xf32>
    %cst_14 = arith.constant 2.000000e-01 : f32
    %29 = vector.broadcast %cst_14 : f32 to vector<4x16x16xf32>
    %30 = arith.mulf %29, %26 : vector<4x16x16xf32>
    %31 = arith.select %28, %26, %30 : vector<4x16x16xi1>, vector<4x16x16xf32>
    %32 = vector.broadcast %7 : vector<1x16x16xf32> to vector<4x16x16xf32>
    %33 = arith.addf %31, %32 : vector<4x16x16xf32>
    %cst_15 = arith.constant dense<0xFF800000> : vector<4x16xf32>
    %34 = vector.multi_reduction <maximumf>, %33, %cst_15 [2] : vector<4x16x16xf32> to vector<4x16xf32>
    %35 = vector.shape_cast %34 : vector<4x16xf32> to vector<4x16x1xf32>
    %36 = vector.broadcast %35 : vector<4x16x1xf32> to vector<4x16x16xf32>
    %37 = arith.subf %33, %36 : vector<4x16x16xf32>
    %38 = math.exp %37 : vector<4x16x16xf32>
    %cst_16 = arith.constant dense<0.000000e+00> : vector<4x16xf32>
    %39 = vector.multi_reduction <add>, %38, %cst_16 [2] : vector<4x16x16xf32> to vector<4x16xf32>
    %40 = vector.shape_cast %39 : vector<4x16xf32> to vector<4x16x1xf32>
    %cst_17 = arith.constant 1.000000e+00 : f32
    %41 = vector.broadcast %cst_17 : f32 to vector<4x16x1xf32>
    %42 = arith.divf %41, %40 : vector<4x16x1xf32>
    %43 = vector.broadcast %42 : vector<4x16x1xf32> to vector<4x16x16xf32>
    %44 = arith.mulf %38, %43 : vector<4x16x16xf32>
    "tpu.trace_start"() <{level = 10 : i32, message = "gnm,gmo->gno"}> : () -> ()
    %cst_18 = arith.constant dense<0.000000e+00> : vector<4x16x8xf32>
    %45 = tpu.matmul %44, %9, %cst_18 {dimension_numbers = #tpu.dot_dimension_numbers<[2], [1], [1], [2], [0, 0, 0, 1, 1, 2], [0], [0]>} : vector<4x16x16xf32>, vector<4x16x8xf32>, vector<4x16x8xf32> -> vector<4x16x8xf32>
    "tpu.trace_stop"() : () -> ()
    %c0_19 = arith.constant 0 : index
    %c0_20 = arith.constant 0 : index
    %c0_21 = arith.constant 0 : index
    %46 = vector.load %arg5[%c0_19, %c0_20, %c0_21] : memref<4x16x8xf32, #tpu.memory_space<vmem>>, vector<4x16x8xf32>
    tpu.vector_store %arg5[%c0_19, %c0_20, %c0_21], %45 {strides = array<i32>} : memref<4x16x8xf32, #tpu.memory_space<vmem>>, vector<4x16x8xf32>,
    return
  }
  func.func @transform_0(%arg0: i32) -> (i32, i32, i32) {
    %c0_i32 = arith.constant 0 : i32
    %c0_i32_0 = arith.constant 0 : i32
    %c0_i32_1 = arith.constant 0 : i32
    return %arg0, %c0_i32, %c0_i32_0 : i32, i32, i32
  }
  func.func @transform_1(%arg0: i32) -> (i32, i32) {
    %c0_i32 = arith.constant 0 : i32
    %c0_i32_0 = arith.constant 0 : i32
    %c0_i32_1 = arith.constant 0 : i32
    return %c0_i32, %c0_i32_0 : i32, i32
  }
  func.func @transform_2(%arg0: i32) -> (i32, i32) {
    %c0_i32 = arith.constant 0 : i32
    %c0_i32_0 = arith.constant 0 : i32
    %c0_i32_1 = arith.constant 0 : i32
    return %c0_i32, %c0_i32_0 : i32, i32
  }
  func.func @transform_3(%arg0: i32) -> (i32, i32) {
    %c0_i32 = arith.constant 0 : i32
    %c0_i32_0 = arith.constant 0 : i32
    %c0_i32_1 = arith.constant 0 : i32
    return %c0_i32, %c0_i32_0 : i32, i32
  }
  func.func @transform_4(%arg0: i32) -> (i32, i32, i32) {
    %c0_i32 = arith.constant 0 : i32
    %c0_i32_0 = arith.constant 0 : i32
    %c0_i32_1 = arith.constant 0 : i32
    return %arg0, %c0_i32, %c0_i32_0 : i32, i32, i32
  }
}

module attributes {stable_mosaic.version = 11 : i64} {
  func.func @gat_kernel(%arg0: i32, %arg1: memref<4x16x8xf32, #tpu.memory_space<vmem>>, %arg2: memref<16x16xf32, #tpu.memory_space<vmem>>, %arg3: memref<8x32xf32, #tpu.memory_space<vmem>>, %arg4: memref<8x4xf32, #tpu.memory_space<vmem>>, %arg5: memref<4x16x32xf32, #tpu.memory_space<vmem>>) attributes {dimension_semantics = [#tpu.dimension_semantics<parallel>], iteration_bounds = array<i64: 2>, scalar_prefetch = 0 : i64, scratch_operands = 0 : i64, tpu.core_type = #tpu.core_type<tc>, window_params = [{transform_indices = @transform_0, window_bounds = array<i64: 4, 16, 8>}, {pipeline_mode = #tpu.pipeline_mode<synchronous>, transform_indices = @transform_1, window_bounds = array<i64: 16, 16>}, {pipeline_mode = #tpu.pipeline_mode<synchronous>, transform_indices = @transform_2, window_bounds = array<i64: 8, 32>}, {pipeline_mode = #tpu.pipeline_mode<synchronous>, transform_indices = @transform_3, window_bounds = array<i64: 8, 4>}, {transform_indices = @transform_4, window_bounds = array<i64: 4, 16, 32>}]} {
    %c0 = arith.constant 0 : index
    %c0_0 = arith.constant 0 : index
    %c0_1 = arith.constant 0 : index
    %0 = vector.load %arg1[%c0, %c0_0, %c0_1] : memref<4x16x8xf32, #tpu.memory_space<vmem>>, vector<4x16x8xf32>
    %1 = vector.shape_cast %0 : vector<4x16x8xf32> to vector<64x8xf32>
    %c0_2 = arith.constant 0 : index
    %c0_3 = arith.constant 0 : index
    %2 = vector.load %arg3[%c0_2, %c0_3] : memref<8x32xf32, #tpu.memory_space<vmem>>, vector<8x32xf32>
    %cst = arith.constant dense<0.000000e+00> : vector<64x32xf32>
    %3 = tpu.matmul %1, %2, %cst {dimension_numbers = #tpu.dot_dimension_numbers<[1], [0], [0], [1], [0, 0, 1, 1], [], []>} : vector<64x8xf32>, vector<8x32xf32>, vector<64x32xf32> -> vector<64x32xf32>
    %c0_4 = arith.constant 0 : index
    %c0_5 = arith.constant 0 : index
    %4 = vector.load %arg4[%c0_4, %c0_5] : memref<8x4xf32, #tpu.memory_space<vmem>>, vector<8x4xf32>
    %cst_6 = arith.constant dense<0.000000e+00> : vector<64x4xf32>
    %5 = tpu.matmul %1, %4, %cst_6 {dimension_numbers = #tpu.dot_dimension_numbers<[1], [0], [0], [1], [0, 0, 1, 1], [], []>} : vector<64x8xf32>, vector<8x4xf32>, vector<64x4xf32> -> vector<64x4xf32>
    %c0_7 = arith.constant 0 : index
    %c0_8 = arith.constant 0 : index
    %6 = vector.load %arg2[%c0_7, %c0_8] : memref<16x16xf32, #tpu.memory_space<vmem>>, vector<16x16xf32>
    %7 = vector.shape_cast %6 : vector<16x16xf32> to vector<1x16x16xf32>
    %8 = tpu.iota {dimensions = array<i32: 2>} : vector<4x16x2xi32>
    %9 = vector.extract_strided_slice %3 {offsets = [0, 0], sizes = [64, 16], strides = [1, 1]} : vector<64x32xf32> to vector<64x16xf32>
    %10 = vector.shape_cast %9 : vector<64x16xf32> to vector<4x16x16xf32>
    %11 = vector.extract_strided_slice %5 {offsets = [0, 0], sizes = [64, 1], strides = [1, 1]} : vector<64x4xf32> to vector<64x1xf32>
    %12 = vector.shape_cast %11 : vector<64x1xf32> to vector<4x16x1xf32>
    %13 = vector.extract_strided_slice %5 {offsets = [0, 1], sizes = [64, 1], strides = [1, 1]} : vector<64x4xf32> to vector<64x1xf32>
    %14 = vector.shape_cast %13 : vector<64x1xf32> to vector<4x16x1xf32>
    %c0_i32 = arith.constant 0 : i32
    %15 = vector.broadcast %c0_i32 : i32 to vector<4x16x2xi32>
    %16 = arith.cmpi eq, %8, %15 : vector<4x16x2xi32>
    %cst_9 = arith.constant 1.000000e+00 : f32
    %17 = vector.shape_cast %12 : vector<4x16x1xf32> to vector<4x16x1xf32>
    %18 = vector.broadcast %17 : vector<4x16x1xf32> to vector<4x16x2xf32>
    %19 = vector.broadcast %cst_9 : f32 to vector<4x16x2xf32>
    %20 = arith.select %16, %18, %19 : vector<4x16x2xi1>, vector<4x16x2xf32>
    %c0_i32_10 = arith.constant 0 : i32
    %21 = vector.broadcast %c0_i32_10 : i32 to vector<4x16x2xi32>
    %22 = arith.cmpi eq, %8, %21 : vector<4x16x2xi32>
    %cst_11 = arith.constant 1.000000e+00 : f32
    %23 = vector.broadcast %cst_11 : f32 to vector<4x16x2xf32>
    %24 = vector.shape_cast %14 : vector<4x16x1xf32> to vector<4x16x1xf32>
    %25 = vector.broadcast %24 : vector<4x16x1xf32> to vector<4x16x2xf32>
    %26 = arith.select %22, %23, %25 : vector<4x16x2xi1>, vector<4x16x2xf32>
    "tpu.trace_start"() <{level = 10 : i32, message = "gnc,gmc->gnm"}> : () -> ()
    %cst_12 = arith.constant dense<0.000000e+00> : vector<4x16x16xf32>
    %27 = tpu.matmul %20, %26, %cst_12 {dimension_numbers = #tpu.dot_dimension_numbers<[2], [2], [1], [1], [0, 0, 0, 1, 1, 1], [0], [0]>} : vector<4x16x2xf32>, vector<4x16x2xf32>, vector<4x16x16xf32> -> vector<4x16x16xf32>
    %cst_13 = arith.constant 0.000000e+00 : f32
    "tpu.trace_stop"() : () -> ()
    %28 = vector.broadcast %cst_13 : f32 to vector<4x16x16xf32>
    %29 = arith.cmpf ogt, %27, %28 : vector<4x16x16xf32>
    %cst_14 = arith.constant 2.000000e-01 : f32
    %30 = vector.broadcast %cst_14 : f32 to vector<4x16x16xf32>
    %31 = arith.mulf %30, %27 : vector<4x16x16xf32>
    %32 = arith.select %29, %27, %31 : vector<4x16x16xi1>, vector<4x16x16xf32>
    %33 = vector.broadcast %7 : vector<1x16x16xf32> to vector<4x16x16xf32>
    %34 = arith.addf %32, %33 : vector<4x16x16xf32>
    %cst_15 = arith.constant dense<0xFF800000> : vector<4x16xf32>
    %35 = vector.multi_reduction <maximumf>, %34, %cst_15 [2] : vector<4x16x16xf32> to vector<4x16xf32>
    %36 = vector.shape_cast %35 : vector<4x16xf32> to vector<4x16x1xf32>
    %37 = vector.broadcast %36 : vector<4x16x1xf32> to vector<4x16x16xf32>
    %38 = arith.subf %34, %37 : vector<4x16x16xf32>
    %39 = math.exp %38 : vector<4x16x16xf32>
    %cst_16 = arith.constant dense<0.000000e+00> : vector<4x16xf32>
    %40 = vector.multi_reduction <add>, %39, %cst_16 [2] : vector<4x16x16xf32> to vector<4x16xf32>
    %41 = vector.shape_cast %40 : vector<4x16xf32> to vector<4x16x1xf32>
    %cst_17 = arith.constant 1.000000e+00 : f32
    %42 = vector.broadcast %cst_17 : f32 to vector<4x16x1xf32>
    %43 = arith.divf %42, %41 : vector<4x16x1xf32>
    %44 = vector.broadcast %43 : vector<4x16x1xf32> to vector<4x16x16xf32>
    %45 = arith.mulf %39, %44 : vector<4x16x16xf32>
    "tpu.trace_start"() <{level = 10 : i32, message = "gnm,gmo->gno"}> : () -> ()
    %cst_18 = arith.constant dense<0.000000e+00> : vector<4x16x16xf32>
    %46 = tpu.matmul %45, %10, %cst_18 {dimension_numbers = #tpu.dot_dimension_numbers<[2], [1], [1], [2], [0, 0, 0, 1, 1, 2], [0], [0]>} : vector<4x16x16xf32>, vector<4x16x16xf32>, vector<4x16x16xf32> -> vector<4x16x16xf32>
    %cst_19 = arith.constant 0.000000e+00 : f32
    "tpu.trace_stop"() : () -> ()
    %47 = vector.broadcast %cst_19 : f32 to vector<4x16x16xf32>
    %48 = arith.cmpf ogt, %46, %47 : vector<4x16x16xf32>
    %cst_20 = arith.constant 0.000000e+00 : f32
    %49 = vector.broadcast %cst_20 : f32 to vector<4x16x16xf32>
    %50 = arith.minimumf %46, %49 : vector<4x16x16xf32>
    %51 = math.exp %50 : vector<4x16x16xf32>
    %cst_21 = arith.constant 1.000000e+00 : f32
    %52 = vector.broadcast %cst_21 : f32 to vector<4x16x16xf32>
    %53 = arith.subf %51, %52 : vector<4x16x16xf32>
    %54 = arith.select %48, %46, %53 : vector<4x16x16xi1>, vector<4x16x16xf32>
    %55 = vector.extract_strided_slice %3 {offsets = [0, 16], sizes = [64, 16], strides = [1, 1]} : vector<64x32xf32> to vector<64x16xf32>
    %56 = vector.shape_cast %55 : vector<64x16xf32> to vector<4x16x16xf32>
    %57 = vector.extract_strided_slice %5 {offsets = [0, 2], sizes = [64, 1], strides = [1, 1]} : vector<64x4xf32> to vector<64x1xf32>
    %58 = vector.shape_cast %57 : vector<64x1xf32> to vector<4x16x1xf32>
    %59 = vector.extract_strided_slice %5 {offsets = [0, 3], sizes = [64, 1], strides = [1, 1]} : vector<64x4xf32> to vector<64x1xf32>
    %60 = vector.shape_cast %59 : vector<64x1xf32> to vector<4x16x1xf32>
    %c0_i32_22 = arith.constant 0 : i32
    %61 = vector.broadcast %c0_i32_22 : i32 to vector<4x16x2xi32>
    %62 = arith.cmpi eq, %8, %61 : vector<4x16x2xi32>
    %cst_23 = arith.constant 1.000000e+00 : f32
    %63 = vector.shape_cast %58 : vector<4x16x1xf32> to vector<4x16x1xf32>
    %64 = vector.broadcast %63 : vector<4x16x1xf32> to vector<4x16x2xf32>
    %65 = vector.broadcast %cst_23 : f32 to vector<4x16x2xf32>
    %66 = arith.select %62, %64, %65 : vector<4x16x2xi1>, vector<4x16x2xf32>
    %c0_i32_24 = arith.constant 0 : i32
    %67 = vector.broadcast %c0_i32_24 : i32 to vector<4x16x2xi32>
    %68 = arith.cmpi eq, %8, %67 : vector<4x16x2xi32>
    %cst_25 = arith.constant 1.000000e+00 : f32
    %69 = vector.broadcast %cst_25 : f32 to vector<4x16x2xf32>
    %70 = vector.shape_cast %60 : vector<4x16x1xf32> to vector<4x16x1xf32>
    %71 = vector.broadcast %70 : vector<4x16x1xf32> to vector<4x16x2xf32>
    %72 = arith.select %68, %69, %71 : vector<4x16x2xi1>, vector<4x16x2xf32>
    "tpu.trace_start"() <{level = 10 : i32, message = "gnc,gmc->gnm"}> : () -> ()
    %cst_26 = arith.constant dense<0.000000e+00> : vector<4x16x16xf32>
    %73 = tpu.matmul %66, %72, %cst_26 {dimension_numbers = #tpu.dot_dimension_numbers<[2], [2], [1], [1], [0, 0, 0, 1, 1, 1], [0], [0]>} : vector<4x16x2xf32>, vector<4x16x2xf32>, vector<4x16x16xf32> -> vector<4x16x16xf32>
    %cst_27 = arith.constant 0.000000e+00 : f32
    "tpu.trace_stop"() : () -> ()
    %74 = vector.broadcast %cst_27 : f32 to vector<4x16x16xf32>
    %75 = arith.cmpf ogt, %73, %74 : vector<4x16x16xf32>
    %cst_28 = arith.constant 2.000000e-01 : f32
    %76 = vector.broadcast %cst_28 : f32 to vector<4x16x16xf32>
    %77 = arith.mulf %76, %73 : vector<4x16x16xf32>
    %78 = arith.select %75, %73, %77 : vector<4x16x16xi1>, vector<4x16x16xf32>
    %79 = vector.broadcast %7 : vector<1x16x16xf32> to vector<4x16x16xf32>
    %80 = arith.addf %78, %79 : vector<4x16x16xf32>
    %cst_29 = arith.constant dense<0xFF800000> : vector<4x16xf32>
    %81 = vector.multi_reduction <maximumf>, %80, %cst_29 [2] : vector<4x16x16xf32> to vector<4x16xf32>
    %82 = vector.shape_cast %81 : vector<4x16xf32> to vector<4x16x1xf32>
    %83 = vector.broadcast %82 : vector<4x16x1xf32> to vector<4x16x16xf32>
    %84 = arith.subf %80, %83 : vector<4x16x16xf32>
    %85 = math.exp %84 : vector<4x16x16xf32>
    %cst_30 = arith.constant dense<0.000000e+00> : vector<4x16xf32>
    %86 = vector.multi_reduction <add>, %85, %cst_30 [2] : vector<4x16x16xf32> to vector<4x16xf32>
    %87 = vector.shape_cast %86 : vector<4x16xf32> to vector<4x16x1xf32>
    %cst_31 = arith.constant 1.000000e+00 : f32
    %88 = vector.broadcast %cst_31 : f32 to vector<4x16x1xf32>
    %89 = arith.divf %88, %87 : vector<4x16x1xf32>
    %90 = vector.broadcast %89 : vector<4x16x1xf32> to vector<4x16x16xf32>
    %91 = arith.mulf %85, %90 : vector<4x16x16xf32>
    "tpu.trace_start"() <{level = 10 : i32, message = "gnm,gmo->gno"}> : () -> ()
    %cst_32 = arith.constant dense<0.000000e+00> : vector<4x16x16xf32>
    %92 = tpu.matmul %91, %56, %cst_32 {dimension_numbers = #tpu.dot_dimension_numbers<[2], [1], [1], [2], [0, 0, 0, 1, 1, 2], [0], [0]>} : vector<4x16x16xf32>, vector<4x16x16xf32>, vector<4x16x16xf32> -> vector<4x16x16xf32>
    %cst_33 = arith.constant 0.000000e+00 : f32
    "tpu.trace_stop"() : () -> ()
    %93 = vector.broadcast %cst_33 : f32 to vector<4x16x16xf32>
    %94 = arith.cmpf ogt, %92, %93 : vector<4x16x16xf32>
    %cst_34 = arith.constant 0.000000e+00 : f32
    %95 = vector.broadcast %cst_34 : f32 to vector<4x16x16xf32>
    %96 = arith.minimumf %92, %95 : vector<4x16x16xf32>
    %97 = math.exp %96 : vector<4x16x16xf32>
    %cst_35 = arith.constant 1.000000e+00 : f32
    %98 = vector.broadcast %cst_35 : f32 to vector<4x16x16xf32>
    %99 = arith.subf %97, %98 : vector<4x16x16xf32>
    %100 = arith.select %94, %92, %99 : vector<4x16x16xi1>, vector<4x16x16xf32>
    %101 = tpu.concatenate %54, %100 in 2 : vector<4x16x16xf32>, vector<4x16x16xf32> -> vector<4x16x32xf32>
    %c0_36 = arith.constant 0 : index
    %c0_37 = arith.constant 0 : index
    %c0_38 = arith.constant 0 : index
    %102 = vector.load %arg5[%c0_36, %c0_37, %c0_38] : memref<4x16x32xf32, #tpu.memory_space<vmem>>, vector<4x16x32xf32>
    tpu.vector_store %arg5[%c0_36, %c0_37, %c0_38], %101 {strides = array<i32>} : memref<4x16x32xf32, #tpu.memory_space<vmem>>, vector<4x16x32xf32>,
    return
  }
  func.func @transform_0(%arg0: i32) -> (i32, i32, i32) {
    %c0_i32 = arith.constant 0 : i32
    %c0_i32_0 = arith.constant 0 : i32
    %c0_i32_1 = arith.constant 0 : i32
    return %arg0, %c0_i32, %c0_i32_0 : i32, i32, i32
  }
  func.func @transform_1(%arg0: i32) -> (i32, i32) {
    %c0_i32 = arith.constant 0 : i32
    %c0_i32_0 = arith.constant 0 : i32
    %c0_i32_1 = arith.constant 0 : i32
    return %c0_i32, %c0_i32_0 : i32, i32
  }
  func.func @transform_2(%arg0: i32) -> (i32, i32) {
    %c0_i32 = arith.constant 0 : i32
    %c0_i32_0 = arith.constant 0 : i32
    %c0_i32_1 = arith.constant 0 : i32
    return %c0_i32, %c0_i32_0 : i32, i32
  }
  func.func @transform_3(%arg0: i32) -> (i32, i32) {
    %c0_i32 = arith.constant 0 : i32
    %c0_i32_0 = arith.constant 0 : i32
    %c0_i32_1 = arith.constant 0 : i32
    return %c0_i32, %c0_i32_0 : i32, i32
  }
  func.func @transform_4(%arg0: i32) -> (i32, i32, i32) {
    %c0_i32 = arith.constant 0 : i32
    %c0_i32_0 = arith.constant 0 : i32
    %c0_i32_1 = arith.constant 0 : i32
    return %arg0, %c0_i32, %c0_i32_0 : i32, i32, i32
  }
}

</mosaic_0001>

<bundles_post_ra>
// kernel: gat_forward.3
= control target key start
LH: loop header
LB: loop body
LE: loop exit
PB: predicated region body
PF: predicated region fallthrough
CT: control target
= control target key end

     0   :  { %s1715_s15 = smov 0   ;;  %s1904_s0 = inlined_call_operand.vmem [shape: f32[8,16,32], index: 0, kind: input, shape index: {}]   ;;  %s1905_s1 = inlined_call_operand.vmem [shape: f32[16,16], index: 1, kind: input, shape index: {}]   ;;  %s1906_s2 = inlined_call_operand.vmem [shape: f32[32,8], index: 2, kind: input, shape index: {}]   ;;  %s1907_s3 = inlined_call_operand.vmem [shape: f32[32,2], index: 3, kind: input, shape index: {}]   ;;  %s1908_s4 = inlined_call_operand.vmem [shape: f32[8,16,8], index: 4, kind: output, shape index: {}]  }
   0x1 LB: > { %s1419_s16 = sadd.s32 4294967295, %s1686_s15   ;;  %p1423_p0 = scmp.ge.s32.totalorder %s1686_s15, 1  ;;  %s1686_s15 = sphi %s1715_s15, %s14_s15  }
   0x2   : > { %p164_p1 = scmp.lt.s32.totalorder %s1686_s15, 3 }
   0x4   : > { %p165_p2 = pnand %p1423_p0, %p164_p1 }
   0x5   : > { %s1424_s21 = sshll.u32 (!%p165_p2), %s1419_s16, 2 }
   0x6   : > { %168 = sbr.rel (%p165_p2) target bundleno = 1083 (0x43b), region = 36  ;;  %p193_p3 = scmp.lt.s32.totalorder (!%p165_p2), %s1424_s21, 7 }
   0xb   : > { %v351_v0 = vld [vmem:[%s1907_s3 + $0x18] sm:$0xff]  ;;  %v350_v1 = vld [vmem:[%s1907_s3 + $0x10] sm:$0xff]  ;;  %v1688_v2 = vmov 1   ;;  %v349_v3 = vld [vmem:[%s1907_s3 + $0x8] sm:$0xff]  ;;  %v1689_v4 = vmov 0   ;;  %s1910_s21 = smov (!%p193_p3, %s1424_s21), 7  ;;  %v459_v26 = vlaneseq }
   0xc   : > { %1550 = vmatprep.subr.mxu1 %v351_v0  ;;  %1636 = vset.pattern.permute.xlu0 %v1688_v2  ;;  %v348_v5 = vld [vmem:[%s1907_s3] sm:$0xff]  ;;  %s1472_s26 = sshll.u32 %s1910_s21, 4  ;;  %vm218_vm0 = vcmask 261120   ;;  %v217_v14 = vld [vmem:[%s1906_s2 + $0x18] sm:$0xff]  ;;  %v216_v15 = vld [vmem:[%s1906_s2 + $0x10] sm:$0xff]  ;;  %vm550_vm2 = vcmask 15360  }
   0xd   : > { %1551 = vmatpush3.msra.mxu1 %v351_v0  ;;  %1637 = vset.pattern.permute.xlu1 %v1689_v4  ;;  %s197_s29 = scalar_lea.vmem %s1904_s0, %s1472_s26  ;;  %v215_v16 = vld [vmem:[%s1906_s2 + $0x8] sm:$0xff]  ;;  %v214_v17 = vld [vmem:[%s1906_s2] sm:$0xff]  ;;  %v1783_v27 = vand.u32 127, %v459_v26  ;;  %vm931_vm5 = vcmask 130048   ;;  %s204_s19 = scalar_lea.vmem %s1908_s4, %s1472_s26  ;;  %vm1352_vm12 = vcmask 64512  }
   0xe   : > { %1552 = vmatprep.subr.mxu1 %v350_v1  ;;  %v206_v6 = vld [vmem:[%s197_s29] sm:$0xff]  ;;  %v207_v7 = vld [vmem:[%s197_s29 + $0x8] sm:$0xff]  ;;  %v208_v8 = vld [vmem:[%s197_s29 + $0x10] sm:$0xff]  ;;  %1530 = vmatprep.subr.mxu0 %v217_v14 }
   0xf   : > { %1553 = vmatpush3.msra.mxu1 %v350_v1  ;;  %1558 = vmatprep.mubr.msk.f32.mxu1 %vm218_vm0, %v206_v6  ;;  %v209_v9 = vld [vmem:[%s197_s29 + $0x18] sm:$0xff]  ;;  %v210_v10 = vld [vmem:[%s197_s29 + $0x20] sm:$0xff]  ;;  %v211_v11 = vld [vmem:[%s197_s29 + $0x28] sm:$0xff]  ;;  %vm461_vm1 = vcmp.eq.s32.totalorder %v1783_v27, 0 }
  0x10   : > { %1554 = vmatprep.subr.mxu1 %v349_v3  ;;  %1538 = vmatprep.mubr.msk.f32.mxu0 %vm218_vm0, %v206_v6  ;;  %v212_v12 = vld [vmem:[%s197_s29 + $0x30] sm:$0xff]  ;;  %v213_v13 = vld [vmem:[%s197_s29 + $0x38] sm:$0xff]  ;;  %v458_v6 = vld [vmem:[%s1905_s1 + $0x8] sm:$0xff] }
  0x11   : > { %1555 = vmatpush3.msra.mxu1 %v349_v3  ;;  %1531 = vmatpush3.msra.mxu0 %v217_v14 }
  0x12   : > { %1556 = vmatprep.subr.mxu1 %v348_v5  ;;  %1532 = vmatprep.subr.mxu0 %v216_v15 }
  0x13   : > { %1557 = vmatpush3.msra.mxu1 %v348_v5  ;;  %1533 = vmatpush3.msra.mxu0 %v216_v15 }
  0x14   : > { %1559 = vmatmul.mubr.msk.f32.vlgmr.msra.gmra.mxu1 %vm218_vm0, %v207_v7  ;;  %1534 = vmatprep.subr.mxu0 %v215_v16 }
  0x15   : > { %1561 = vmatprep.mubr.msk.f32.mxu1 %vm218_vm0, %v208_v8  ;;  %1535 = vmatpush3.msra.mxu0 %v215_v16 }
  0x16   : > { %1536 = vmatprep.subr.mxu0 %v214_v17 }
  0x17   : > { %1537 = vmatpush3.msra.mxu0 %v214_v17 }
  0x18   : > { %1562 = vmatmul.mubr.msk.f32.gmra.mxu1 %vm218_vm0, %v209_v9  ;;  %1539 = vmatmul.mubr.msk.f32.vlgmr.msra.gmra.mxu0 %vm218_vm0, %v207_v7 }
  0x19   : > { %1564 = vmatprep.mubr.msk.f32.mxu1 %vm218_vm0, %v210_v10  ;;  %1541 = vmatprep.mubr.msk.f32.mxu0 %vm218_vm0, %v208_v8 }
  0x1c   : > { %1565 = vmatmul.mubr.msk.f32.gmra.mxu1 %vm218_vm0, %v211_v11  ;;  %1542 = vmatmul.mubr.msk.f32.gmra.mxu0 %vm218_vm0, %v209_v9 }
  0x1d   : > { %1567 = vmatprep.mubr.msk.f32.mxu1 %vm218_vm0, %v212_v12  ;;  %1544 = vmatprep.mubr.msk.f32.mxu0 %vm218_vm0, %v210_v10  ;;  %v457_v10 = vld [vmem:[%s1905_s1] sm:$0xff] }
  0x20   : > { %1568 = vmatmul.mubr.msk.f32.gmra.mxu1 %vm218_vm0, %v213_v13  ;;  %1545 = vmatmul.mubr.msk.f32.gmra.mxu0 %vm218_vm0, %v211_v11 }
  0x21   : > { %1547 = vmatprep.mubr.msk.f32.mxu0 %vm218_vm0, %v212_v12 }
  0x24   : > { %1548 = vmatmul.mubr.msk.f32.gmra.mxu0 %vm218_vm0, %v213_v13 }
  0xd4   : > { %v1560_v18 = vpop.f32.mrf.mxu1 }
  0xd5   : > { %469 = vperm.xlu1 %1637, %v1560_v18   ;;  %515 = vperm.xlu0 %1636, %v1560_v18  }
  0xd6   : > { %v418_v19 = vpop.f32.mrf.mxu1 }
  0xd8   : > { %v1563_v20 = vpop.f32.mrf.mxu1  ;;  %v1540_v44 = vpop.f32.mrf.mxu0 }
  0xd9   : > { %1638 = vset.pattern.permute.xlu1 %v1688_v2  ;;  %1639 = vset.pattern.permute.xlu0 %v1689_v4 }
  0xda   : > { %464 = vperm.xlu0 %1639, %v418_v19   ;;  %511 = vperm.xlu1 %1638, %v418_v19   ;;  %v428_v21 = vpop.f32.mrf.mxu1  ;;  %v309_v49 = vpop.f32.mrf.mxu0 }
  0xdc   : > { %v1566_v22 = vpop.f32.mrf.mxu1  ;;  %v1543_v53 = vpop.f32.mrf.mxu0 }
  0xde   : > { %1640 = vset.pattern.permute.xlu0 %v1688_v2  ;;  %519 = vperm.xlu1 %1638, %v428_v21   ;;  %v438_v23 = vpop.f32.mrf.mxu1  ;;  %v319_v57 = vpop.f32.mrf.mxu0 }
  0xdf   : > { %523 = vperm.xlu0 %1640, %v1563_v20  }
  0xe0   : > { %v1569_v24 = vpop.f32.mrf.mxu1  ;;  %v1837_v62 = vpop.f32.mrf.mxu0 }
  0xe2   : > { %531 = vperm.xlu1 %1638, %v1566_v22   ;;  %v448_v25 = vpop.f32.mrf.mxu1  ;;  %v1843_v1 = vpop.f32.mrf.mxu0 }
  0xe3   : > { %1641 = vset.pattern.permute.xlu0 %v1689_v4 }
  0xe4   : > { %479 = vperm.xlu0 %1641, %v1563_v20  }
  0xe6   : > { %527 = vperm.xlu1 %1638, %v438_v23  }
  0xe8   : > { %474 = vperm.xlu0 %1641, %v428_v21  }
  0xea   : > { %1642 = vset.pattern.permute.xlu1 %v1689_v4 }
  0xeb   : > { %484 = vperm.xlu1 %1642, %v438_v23  }
  0xec   : > { %1645 = vset.pattern.permute.xlu0 %v1688_v2 }
  0xed   : > { %535 = vperm.xlu0 %1645, %v448_v25  }
  0xef   : > { %1643 = vset.pattern.permute.xlu1 %v1688_v2 }
  0xf0   : > { %539 = vperm.xlu1 %1643, %v1569_v24  }
  0xf1   : > { %1646 = vset.pattern.permute.xlu0 %v1689_v4 }
  0xf2   : > { %494 = vperm.xlu0 %1646, %v448_v25  }
  0xf4   : > { %1644 = vset.pattern.permute.xlu1 %v1689_v4 }
  0xf5   : > { %489 = vperm.xlu1 %1644, %v1566_v22  }
  0xf6   : > { %1647 = vset.pattern.permute.xlu0 %v1688_v2  ;;  %v1847_v2 = vpop.f32.mrf.mxu0 }
  0xf8   : > { %v1850_v3 = vpop.f32.mrf.mxu0 }
  0xf9   : > { %499 = vperm.xlu1 %1644, %v1569_v24  }
 0x150   : > { %v470_v28 = vpop.permute.xlu1 %469  ;;  %v516_v29 = vpop.permute.xlu0 %515 }
 0x151   : > { %v543_v30 = vsel %vm461_vm1, 1.0, %v516_v29  ;;  %v503_v36 = vsel %vm461_vm1, %v470_v28, 1.0 }
 0x152   : > { %1570 = vmatprep.subr.msk.mxu0 %vm550_vm2, %v543_v30 }
 0x153   : > { %1571 = vmatpush3.xpose.msk.msra.mxu0 %vm550_vm2, %v543_v30 }
 0x155   : > { %v465_v31 = vpop.permute.xlu0 %464  ;;  %v512_v32 = vpop.permute.xlu1 %511 }
 0x156   : > { %v502_v33 = vsel %vm461_vm1, %v465_v31, 1.0  ;;  %v542_v34 = vsel %vm461_vm1, 1.0, %v512_v32 }
 0x157   : > { %1572 = vmatprep.subr.msk.mxu0 %vm550_vm2, %v542_v34  ;;  %1574 = vmatprep.mubr.msk.f32.mxu0 %vm550_vm2, %v502_v33 }
 0x158   : > { %1573 = vmatpush3.xpose.msk.msra.mxu0 %vm550_vm2, %v542_v34 }
 0x159   : > { %v520_v35 = vpop.permute.xlu1 %519 }
 0x15a   : > { %v524_v37 = vpop.permute.xlu0 %523  ;;  %v544_v39 = vsel %vm461_vm1, 1.0, %v520_v35 }
 0x15b   : > { %v545_v38 = vsel %vm461_vm1, 1.0, %v524_v37  ;;  %1575 = vmatmul.mubr.msk.f32.vlgmr.msra.gmra.mxu0 %vm550_vm2, %v503_v36 }
 0x15c   : > { %1577 = vmatprep.subr.msk.mxu1 %vm550_vm2, %v545_v38 }
 0x15d   : > { %1578 = vmatpush3.xpose.msk.msra.mxu1 %vm550_vm2, %v545_v38  ;;  %v532_v40 = vpop.permute.xlu1 %531 }
 0x15e   : > { %v547_v41 = vsel %vm461_vm1, 1.0, %v532_v40  ;;  %1579 = vmatprep.subr.msk.mxu1 %vm550_vm2, %v544_v39 }
 0x15f   : > { %v480_v42 = vpop.permute.xlu0 %479  ;;  %1584 = vmatprep.subr.msk.mxu0 %vm550_vm2, %v547_v41 }
 0x160   : > { %1585 = vmatpush3.xpose.msk.msra.mxu0 %vm550_vm2, %v547_v41  ;;  %v505_v48 = vsel %vm461_vm1, %v480_v42, 1.0 }
 0x161   : > { %1580 = vmatpush3.xpose.msk.msra.mxu1 %vm550_vm2, %v544_v39  ;;  %v528_v43 = vpop.permute.xlu1 %527 }
 0x162   : > { %v546_v45 = vsel %vm461_vm1, 1.0, %v528_v43 }
 0x163   : > { %v475_v46 = vpop.permute.xlu0 %474  ;;  %1586 = vmatprep.subr.msk.mxu0 %vm550_vm2, %v546_v45 }
 0x164   : > { %v504_v47 = vsel %vm461_vm1, %v475_v46, 1.0  ;;  %1587 = vmatpush3.xpose.msk.msra.mxu0 %vm550_vm2, %v546_v45 }
 0x165   : > { %1581 = vmatprep.mubr.msk.f32.mxu1 %vm550_vm2, %v504_v47  ;;  %1598 = vmatprep.subr.mxu0 %v1540_v44 }
 0x166   : > { %1582 = vmatmul.mubr.msk.f32.vlgmr.msra.gmra.mxu1 %vm550_vm2, %v505_v48  ;;  %v485_v50 = vpop.permute.xlu1 %484 }
 0x167   : > { %v506_v51 = vsel %vm461_vm1, %v485_v50, 1.0 }
 0x168   : > { %1588 = vmatprep.mubr.msk.f32.mxu0 %vm550_vm2, %v506_v51  ;;  %v536_v52 = vpop.permute.xlu0 %535 }
 0x169   : > { %v548_v58 = vsel %vm461_vm1, 1.0, %v536_v52 }
 0x16b   : > { %v540_v54 = vpop.permute.xlu1 %539 }
 0x16c   : > { %v549_v55 = vsel %vm461_vm1, 1.0, %v540_v54 }
 0x16d   : > { %1591 = vmatprep.subr.msk.mxu1 %vm550_vm2, %v549_v55  ;;  %v495_v56 = vpop.permute.xlu0 %494 }
 0x16e   : > { %v508_v59 = vsel %vm461_vm1, %v495_v56, 1.0  ;;  %1592 = vmatpush3.xpose.msk.msra.mxu1 %vm550_vm2, %v549_v55 }
 0x16f   : > { %1593 = vmatprep.subr.msk.mxu1 %vm550_vm2, %v548_v58  ;;  %1595 = vmatprep.mubr.msk.f32.mxu1 %vm550_vm2, %v508_v59 }
 0x170   : > { %v490_v60 = vpop.permute.xlu1 %489 }
 0x171   : > { %v507_v61 = vsel %vm461_vm1, %v490_v60, 1.0 }
 0x172   : > { %1589 = vmatmul.mubr.msk.f32.vlgmr.msra.gmra.mxu0 %vm550_vm2, %v507_v61  ;;  %1594 = vmatpush3.xpose.msk.msra.mxu1 %vm550_vm2, %v548_v58 }
 0x173   : > { %1599 = vmatpush3.msra.mxu0 %v1540_v44  ;;  %1605 = vmatprep.subr.mxu1 %v1543_v53 }
 0x174   : > { %v500_v63 = vpop.permute.xlu1 %499  ;;  %1600 = vmatprep.subr.mxu0 %v309_v49 }
 0x175   : > { %v509_v0 = vsel %vm461_vm1, %v500_v63, 1.0  ;;  %1601 = vmatpush3.msra.mxu0 %v309_v49 }
 0x176   : > { %1596 = vmatmul.mubr.msk.f32.vlgmr.msra.gmra.mxu1 %vm550_vm2, %v509_v0  ;;  %1612 = vmatprep.subr.mxu0 %v1837_v62 }
 0x177   : > { %1606 = vmatpush3.msra.mxu1 %v1543_v53 }
 0x178   : > { %1607 = vmatprep.subr.mxu1 %v319_v57 }
 0x179   : > { %1608 = vmatpush3.msra.mxu1 %v319_v57 }
 0x17a   : > { %1619 = vmatprep.subr.mxu1 %v1847_v2 }
 0x21b   : > { %v1576_v4 = vpop.f32.mrf.mxu0 }
 0x21c   : > { %vm900_vm3 = vcmp.gt.f32.partialorder %v1576_v4, 0.0  ;;  %v908_v5 = vmul.f32 0.2, %v1576_v4 }
 0x21d   : > { %v629_v7 = vpop.f32.mrf.mxu0 }
 0x21e   : > { %vm899_vm4 = vcmp.gt.f32.partialorder %v629_v7, 0.0  ;;  %v907_v8 = vmul.f32 0.2, %v629_v7  ;;  %v916_v9 = vsel %vm900_vm3, %v1576_v4, %v908_v5 }
 0x21f   : > { %v924_v11 = vadd.f32 %v916_v9, %v458_v6 }
 0x220   : > { %v915_v12 = vsel %vm899_vm4, %v629_v7, %v907_v8 }
 0x221   : > { %v935_v13 = vsel %vm931_vm5, %v924_v11, -inf  ;;  %v923_v14 = vadd.f32 %v915_v12, %v457_v10 }
 0x222   : > { %936 = vmax.xlane.f32.xlu0 %v935_v13 }
 0x223   : > { %v932_v15 = vsel %vm931_vm5, %v923_v14, -inf }
 0x224   : > { %933 = vmax.xlane.f32.xlu1 %v932_v15 }
 0x226   : > { %v1583_v16 = vpop.f32.mrf.mxu1 }
 0x227   : > { %vm902_vm6 = vcmp.gt.f32.partialorder %v1583_v16, 0.0  ;;  %v910_v17 = vmul.f32 0.2, %v1583_v16 }
 0x228   : > { %v716_v18 = vpop.f32.mrf.mxu1 }
 0x229   : > { %vm901_vm7 = vcmp.gt.f32.partialorder %v716_v18, 0.0  ;;  %v909_v19 = vmul.f32 0.2, %v716_v18  ;;  %v918_v20 = vsel %vm902_vm6, %v1583_v16, %v910_v17 }
 0x22a   : > { %v926_v21 = vadd.f32 %v918_v20, %v458_v6 }
 0x22b   : > { %v917_v22 = vsel %vm901_vm7, %v716_v18, %v909_v19 }
 0x22c   : > { %v941_v23 = vsel %vm931_vm5, %v926_v21, -inf  ;;  %v925_v24 = vadd.f32 %v917_v22, %v457_v10 }
 0x22d   : > { %942 = vmax.xlane.f32.xlu1 %v941_v23 }
 0x22e   : > { %v938_v25 = vsel %vm931_vm5, %v925_v24, -inf }
 0x22f   : > { %939 = vmax.xlane.f32.xlu0 %v938_v25 }
 0x232   : > { %v1590_v26 = vpop.f32.mrf.mxu0 }
 0x233   : > { %vm904_vm8 = vcmp.gt.f32.partialorder %v1590_v26, 0.0  ;;  %v912_v27 = vmul.f32 0.2, %v1590_v26 }
 0x234   : > { %v803_v28 = vpop.f32.mrf.mxu0 }
 0x235   : > { %vm903_vm9 = vcmp.gt.f32.partialorder %v803_v28, 0.0  ;;  %v911_v29 = vmul.f32 0.2, %v803_v28  ;;  %v920_v30 = vsel %vm904_vm8, %v1590_v26, %v912_v27 }
 0x236   : > { %v1597_v31 = vpop.f32.mrf.mxu1  ;;  %v928_v32 = vadd.f32 %v920_v30, %v458_v6 }
 0x237   : > { %vm906_vm10 = vcmp.gt.f32.partialorder %v1597_v31, 0.0  ;;  %v914_v33 = vmul.f32 0.2, %v1597_v31  ;;  %v919_v34 = vsel %vm903_vm9, %v803_v28, %v911_v29 }
 0x238   : > { %v890_v35 = vpop.f32.mrf.mxu1  ;;  %v947_v36 = vsel %vm931_vm5, %v928_v32, -inf  ;;  %v927_v37 = vadd.f32 %v919_v34, %v457_v10 }
 0x239   : > { %vm905_vm11 = vcmp.gt.f32.partialorder %v890_v35, 0.0  ;;  %v913_v38 = vmul.f32 0.2, %v890_v35  ;;  %948 = vmax.xlane.f32.xlu1 %v947_v36  ;;  %v922_v39 = vsel %vm906_vm10, %v1597_v31, %v914_v33 }
 0x23a   : > { %v944_v40 = vsel %vm931_vm5, %v927_v37, -inf  ;;  %v930_v41 = vadd.f32 %v922_v39, %v458_v6 }
 0x23b   : > { %945 = vmax.xlane.f32.xlu0 %v944_v40  ;;  %v921_v42 = vsel %vm905_vm11, %v890_v35, %v913_v38 }
 0x23c   : > { %v953_v43 = vsel %vm931_vm5, %v930_v41, -inf  ;;  %v929_v44 = vadd.f32 %v921_v42, %v457_v10 }
 0x23d   : > { %954 = vmax.xlane.f32.xlu1 %v953_v43 }
 0x23e   : > { %v950_v45 = vsel %vm931_vm5, %v929_v44, -inf }
 0x23f   : > { %951 = vmax.xlane.f32.xlu0 %v950_v45 }
 0x2ab   : > { %v937_v46 = vpop.xlane.xlu0 %936 }
 0x2ac   : > { %v957_v47 = vsub.f32 %v924_v11, %v937_v46 }
 0x2ad   : > { %v934_v48 = vpop.xlane.xlu1 %933 }
 0x2ae   : > { %v966_v49 = vmul.f32 1.442695, %v957_v47  ;;  %v956_v50 = vsub.f32 %v923_v14, %v934_v48 }
 0x2b0   : > { %1648 = vpow2.f32 %v966_v49  ;;  %v964_v51 = vmul.f32 1.442695, %v956_v50 }
 0x2b2   : > { %1650 = vpow2.f32 %v964_v51 }
 0x2b6   : > { %v943_v52 = vpop.xlane.xlu1 %942 }
 0x2b7   : > { %v959_v53 = vsub.f32 %v926_v21, %v943_v52 }
 0x2b8   : > { %v940_v54 = vpop.xlane.xlu0 %939 }
 0x2b9   : > { %v970_v55 = vmul.f32 1.442695, %v959_v53  ;;  %v958_v56 = vsub.f32 %v925_v24, %v940_v54 }
 0x2bb   : > { %1652 = vpow2.f32 %v970_v55  ;;  %v968_v57 = vmul.f32 1.442695, %v958_v56 }
 0x2bd   : > { %v1649_v58 = vpop.eup %1648  ;;  %1654 = vpow2.f32 %v968_v57 }
 0x2be   : > { %v983_v59 = vsel %vm931_vm5, %v1649_v58, 0.0 }
 0x2bf   : > { %v1651_v60 = vpop.eup %1650  ;;  %984 = vadd.xlane.f32.xlu1 %v983_v59 }
 0x2c0   : > { %v980_v61 = vsel %vm931_vm5, %v1651_v60, 0.0 }
 0x2c1   : > { %981 = vadd.xlane.f32.xlu0 %v980_v61 }
 0x2c2   : > { %v949_v63 = vpop.xlane.xlu1 %948 }
 0x2c3   : > { %v961_v0 = vsub.f32 %v928_v32, %v949_v63 }
 0x2c4   : > { %v946_v4 = vpop.xlane.xlu0 %945 }
 0x2c5   : > { %v974_v5 = vmul.f32 1.442695, %v961_v0  ;;  %v960_v6 = vsub.f32 %v927_v37, %v946_v4 }
 0x2c6   : > { %v955_v7 = vpop.xlane.xlu1 %954 }
 0x2c7   : > { %1656 = vpow2.f32 %v974_v5  ;;  %v972_v8 = vmul.f32 1.442695, %v960_v6  ;;  %v963_v9 = vsub.f32 %v930_v41, %v955_v7 }
 0x2c8   : > { %v1653_v10 = vpop.eup %1652  ;;  %v952_v11 = vpop.xlane.xlu0 %951 }
 0x2c9   : > { %1658 = vpow2.f32 %v972_v8  ;;  %v978_v12 = vmul.f32 1.442695, %v963_v9  ;;  %v962_v13 = vsub.f32 %v929_v44, %v952_v11  ;;  %v989_v14 = vsel %vm931_vm5, %v1653_v10, 0.0 }
 0x2ca   : > { %v1655_v15 = vpop.eup %1654  ;;  %990 = vadd.xlane.f32.xlu1 %v989_v14 }
 0x2cb   : > { %1660 = vpow2.f32 %v978_v12  ;;  %v976_v16 = vmul.f32 1.442695, %v962_v13  ;;  %v986_v17 = vsel %vm931_vm5, %v1655_v15, 0.0 }
 0x2cc   : > { %987 = vadd.xlane.f32.xlu0 %v986_v17 }
 0x2cd   : > { %1662 = vpow2.f32 %v976_v16 }
 0x2d4   : > { %v1657_v18 = vpop.eup %1656 }
 0x2d5   : > { %v995_v19 = vsel %vm931_vm5, %v1657_v18, 0.0 }
 0x2d6   : > { %v1659_v20 = vpop.eup %1658  ;;  %996 = vadd.xlane.f32.xlu1 %v995_v19 }
 0x2d7   : > { %v992_v21 = vsel %vm931_vm5, %v1659_v20, 0.0 }
 0x2d8   : > { %v1661_v22 = vpop.eup %1660  ;;  %993 = vadd.xlane.f32.xlu0 %v992_v21 }
 0x2d9   : > { %v1001_v23 = vsel %vm931_vm5, %v1661_v22, 0.0 }
 0x2da   : > { %v1663_v24 = vpop.eup %1662  ;;  %1002 = vadd.xlane.f32.xlu1 %v1001_v23 }
 0x2db   : > { %v998_v25 = vsel %vm931_vm5, %v1663_v24, 0.0 }
 0x2dc   : > { %999 = vadd.xlane.f32.xlu0 %v998_v25 }
 0x348   : > { %v985_v26 = vpop.xlane.xlu1 %984 }
 0x349   : > { %1664 = vrcp.f32 %v985_v26 }
 0x34a   : > { %v982_v27 = vpop.xlane.xlu0 %981 }
 0x34b   : > { %1666 = vrcp.f32 %v982_v27 }
 0x353   : > { %v991_v28 = vpop.xlane.xlu1 %990 }
 0x354   : > { %1668 = vrcp.f32 %v991_v28 }
 0x355   : > { %v988_v29 = vpop.xlane.xlu0 %987 }
 0x356   : > { %1670 = vrcp.f32 %v988_v29  ;;  %v1665_v30 = vpop.eup %1664 }
 0x357   : > { %v1021_v33 = vmul.f32 %v1665_v30, %v1649_v58 }
 0x358   : > { %v1667_v31 = vpop.eup %1666 }
 0x359   : > { %v1020_v32 = vmul.f32 %v1667_v31, %v1651_v60 }
 0x35b   : > { %1602 = vmatprep.mubr.msk.f32.mxu0 %vm931_vm5, %v1020_v32 }
 0x35c   : > { %1603 = vmatmul.mubr.msk.f32.vlgmr.msra.gmra.mxu0 %vm931_vm5, %v1021_v33 }
 0x35d   : > { %1613 = vmatpush3.msra.mxu0 %v1837_v62 }
 0x35e   : > { %1614 = vmatprep.subr.mxu0 %v1843_v1 }
 0x35f   : > { %1615 = vmatpush3.msra.mxu0 %v1843_v1  ;;  %v997_v34 = vpop.xlane.xlu1 %996 }
 0x360   : > { %1672 = vrcp.f32 %v997_v34 }
 0x361   : > { %v994_v35 = vpop.xlane.xlu0 %993  ;;  %v1669_v36 = vpop.eup %1668 }
 0x362   : > { %1674 = vrcp.f32 %v994_v35  ;;  %v1023_v41 = vmul.f32 %v1669_v36, %v1653_v10 }
 0x363   : > { %v1671_v37 = vpop.eup %1670  ;;  %v1003_v38 = vpop.xlane.xlu1 %1002 }
 0x364   : > { %v1022_v39 = vmul.f32 %v1671_v37, %v1655_v15  ;;  %1676 = vrcp.f32 %v1003_v38 }
 0x365   : > { %v1000_v40 = vpop.xlane.xlu0 %999 }
 0x366   : > { %1678 = vrcp.f32 %v1000_v40  ;;  %1609 = vmatprep.mubr.msk.f32.mxu1 %vm931_vm5, %v1022_v39 }
 0x367   : > { %1610 = vmatmul.mubr.msk.f32.vlgmr.msra.gmra.mxu1 %vm931_vm5, %v1023_v41 }
 0x368   : > { %1620 = vmatpush3.msra.mxu1 %v1847_v2 }
 0x369   : > { %1621 = vmatprep.subr.mxu1 %v1850_v3 }
 0x36a   : > { %1622 = vmatpush3.msra.mxu1 %v1850_v3 }
 0x36d   : > { %v1673_v62 = vpop.eup %1672 }
 0x36e   : > { %v1025_v43 = vmul.f32 %v1673_v62, %v1657_v18 }
 0x36f   : > { %v1675_v1 = vpop.eup %1674 }
 0x370   : > { %v1024_v42 = vmul.f32 %v1675_v1, %v1659_v20 }
 0x371   : > { %v1677_v44 = vpop.eup %1676 }
 0x372   : > { %1616 = vmatprep.mubr.msk.f32.mxu0 %vm931_vm5, %v1024_v42  ;;  %v1027_v47 = vmul.f32 %v1677_v44, %v1661_v22 }
 0x373   : > { %v1679_v45 = vpop.eup %1678  ;;  %1617 = vmatmul.mubr.msk.f32.vlgmr.msra.gmra.mxu0 %vm931_vm5, %v1025_v43 }
 0x374   : > { %v1026_v46 = vmul.f32 %v1679_v45, %v1663_v24 }
 0x376   : > { %1623 = vmatprep.mubr.msk.f32.mxu1 %vm931_vm5, %v1026_v46 }
 0x377   : > { %1624 = vmatmul.mubr.msk.f32.vlgmr.msra.gmra.mxu1 %vm931_vm5, %v1027_v47 }
 0x41c   : > { %v1604_v2 = vpop.f32.mrf.mxu0 }
 0x41d   : > { %1354 = vst.msk [vmem:[%s204_s19 + $0x8] sm:$0xff] %vm1352_vm12, %v1604_v2 }
 0x41e   : > { %v1100_v3 = vpop.f32.mrf.mxu0 }
 0x41f   : > { %1353 = vst.msk [vmem:[%s204_s19] sm:$0xff] %vm1352_vm12, %v1100_v3 }
 0x427   : > { %v1611_v48 = vpop.f32.mrf.mxu1 }
 0x428   : > { %1356 = vst.msk [vmem:[%s204_s19 + $0x18] sm:$0xff] %vm1352_vm12, %v1611_v48 }
 0x429   : > { %v1181_v49 = vpop.f32.mrf.mxu1 }
 0x42a   : > { %1355 = vst.msk [vmem:[%s204_s19 + $0x10] sm:$0xff] %vm1352_vm12, %v1181_v49 }
 0x433   : > { %v1618_v50 = vpop.f32.mrf.mxu0 }
 0x434   : > { %1358 = vst.msk [vmem:[%s204_s19 + $0x28] sm:$0xff] %vm1352_vm12, %v1618_v50 }
 0x435   : > { %v1262_v51 = vpop.f32.mrf.mxu0 }
 0x436   : > { %1357 = vst.msk [vmem:[%s204_s19 + $0x20] sm:$0xff] %vm1352_vm12, %v1262_v51 }
 0x437   : > { %v1625_v52 = vpop.f32.mrf.mxu1 }
 0x438   : > { %1360 = vst.msk [vmem:[%s204_s19 + $0x38] sm:$0xff] %vm1352_vm12, %v1625_v52 }
 0x439   : > { %v1343_v53 = vpop.f32.mrf.mxu1 }
 0x43a   : > { %1359 = vst.msk [vmem:[%s204_s19 + $0x30] sm:$0xff] %vm1352_vm12, %v1343_v53 }
 0x43b PF: > { %s14_s15 = sadd.s32 1, %s1686_s15  }
 0x43c   : > { %p11_p4 = scmp.ge.s32.totalorder %s14_s15, 4  }
 0x43e   :  { %13 = sbr.rel (!%p11_p4) target bundleno = 1 (0x1), region = 66 }

// kernel: gat_forward.2
= control target key start
LH: loop header
LB: loop body
LE: loop exit
PB: predicated region body
PF: predicated region fallthrough
CT: control target
= control target key end

     0   :  { %s2947_s15 = smov 0   ;;  %s3420_s0 = inlined_call_operand.vmem [shape: f32[8,16,8], index: 0, kind: input, shape index: {}]   ;;  %s3421_s1 = inlined_call_operand.vmem [shape: f32[16,16], index: 1, kind: input, shape index: {}]   ;;  %s3422_s2 = inlined_call_operand.vmem [shape: f32[8,32], index: 2, kind: input, shape index: {}]   ;;  %s3423_s3 = inlined_call_operand.vmem [shape: f32[8,4], index: 3, kind: input, shape index: {}]   ;;  %s3424_s4 = inlined_call_operand.vmem [shape: f32[8,16,32], index: 4, kind: output, shape index: {}]  }
   0x1 LB: > { %s2461_s16 = sadd.s32 4294967295, %s2914_s15   ;;  %p2465_p0 = scmp.ge.s32.totalorder %s2914_s15, 1  ;;  %s2914_s15 = sphi %s2947_s15, %s14_s15  }
   0x2   : > { %p164_p1 = scmp.lt.s32.totalorder %s2914_s15, 3 }
   0x4   : > { %p165_p2 = pnand %p2465_p0, %p164_p1 }
   0x5   : > { %s2466_s19 = sshll.u32 (!%p165_p2), %s2461_s16, 2  ;;  %s2920_s30 = smov (!%p165_p2), 112  }
   0x6   : > { %168 = sbr.rel (%p165_p2) target bundleno = 1749 (0x6d5), region = 36  ;;  %p193_p3 = scmp.lt.s32.totalorder (!%p165_p2), %s2466_s19, 7 }
   0x7   : > { %s2921_s5 = smov (!%p165_p2), 16  }
   0xb   : > { %v345_v0 = vld [vmem:[%s3423_s3] sm:$0xff]  ;;  %v2916_v1 = vmov 1   ;;  %v2917_v2 = vmov 0   ;;  %s3426_s19 = smov (!%p193_p3, %s2466_s19), 7  ;;  %vm215_vm0 = vcmask 64512   ;;  %v453_v20 = vlaneseq }
   0xc   : > { %2652 = vmatprep.subr.mxu1 %v345_v0  ;;  %2792 = vset.pattern.permute.xlu0 %v2916_v1  ;;  %s2554_s20 = sshll.u32 %s3426_s19, 4  ;;  %v214_v11 = vld [vmem:[%s3422_s2] sm:$0xff]  ;;  %vm544_vm2 = vcmask 15360   ;;  %v2918_v61 = vmov 3   ;;  %vm925_vm5 = vcmask 130048  }
   0xd   : > { %2653 = vmatpush3.msra.mxu1 %v345_v0  ;;  %2793 = vset.pattern.permute.xlu1 %v2917_v2  ;;  %s197_s23 = scalar_lea.vmem %s3420_s0, %s2554_s20  ;;  %v3017_v21 = vand.u32 127, %v453_v20  ;;  %s3375_s8 = scalar_lea.vmem %s3424_s4, %s2554_s20 }
   0xe   : > { %v206_v3 = vld [vmem:[%s197_s23] sm:$0xff]  ;;  %v207_v4 = vld [vmem:[%s197_s23 + $0x8] sm:$0xff]  ;;  %v208_v5 = vld [vmem:[%s197_s23 + $0x10] sm:$0xff]  ;;  %2638 = vmatprep.subr.mxu0 %v214_v11 }
   0xf   : > { %2654 = vmatprep.mubr.msk.f32.mxu1 %vm215_vm0, %v206_v3  ;;  %2640 = vmatprep.mubr.msk.f32.mxu0 %vm215_vm0, %v206_v3  ;;  %v209_v6 = vld [vmem:[%s197_s23 + $0x18] sm:$0xff]  ;;  %v210_v7 = vld [vmem:[%s197_s23 + $0x20] sm:$0xff]  ;;  %v211_v8 = vld [vmem:[%s197_s23 + $0x28] sm:$0xff]  ;;  %vm455_vm1 = vcmp.eq.s32.totalorder %v3017_v21, 0 }
  0x10   : > { %2655 = vmatmul.mubr.msk.f32.vlgmr.msra.gmra.mxu1 %vm215_vm0, %v207_v4  ;;  %v212_v9 = vld [vmem:[%s197_s23 + $0x30] sm:$0xff]  ;;  %v213_v10 = vld [vmem:[%s197_s23 + $0x38] sm:$0xff]  ;;  %2639 = vmatpush3.msra.mxu0 %v214_v11 }
  0x11   : > { %2657 = vmatprep.mubr.msk.f32.mxu1 %vm215_vm0, %v208_v5  ;;  %2641 = vmatmul.mubr.msk.f32.vlgmr.msra.gmra.mxu0 %vm215_vm0, %v207_v4 }
  0x12   : > { %2643 = vmatprep.mubr.msk.f32.mxu0 %vm215_vm0, %v208_v5  ;;  %v3112_v5 = vld [vmem:[%s3421_s1] sm:$0xff] }
  0x14   : > { %2658 = vmatmul.mubr.msk.f32.gmra.mxu1 %vm215_vm0, %v209_v6 }
  0x15   : > { %2660 = vmatprep.mubr.msk.f32.mxu1 %vm215_vm0, %v210_v7  ;;  %2644 = vmatmul.mubr.msk.f32.gmra.mxu0 %vm215_vm0, %v209_v6 }
  0x16   : > { %2646 = vmatprep.mubr.msk.f32.mxu0 %vm215_vm0, %v210_v7 }
  0x18   : > { %2661 = vmatmul.mubr.msk.f32.gmra.mxu1 %vm215_vm0, %v211_v8 }
  0x19   : > { %2663 = vmatprep.mubr.msk.f32.mxu1 %vm215_vm0, %v212_v9  ;;  %2647 = vmatmul.mubr.msk.f32.gmra.mxu0 %vm215_vm0, %v211_v8 }
  0x1a   : > { %2649 = vmatprep.mubr.msk.f32.mxu0 %vm215_vm0, %v212_v9 }
  0x1c   : > { %2664 = vmatmul.mubr.msk.f32.gmra.mxu1 %vm215_vm0, %v213_v10 }
  0x1d   : > { %2650 = vmatmul.mubr.msk.f32.gmra.mxu0 %vm215_vm0, %v213_v10 }
  0xd0   : > { %v2985_v12 = vpop.f32.mrf.mxu1 }
  0xd1   : > { %463 = vperm.xlu1 %2793, %v2985_v12   ;;  %509 = vperm.xlu0 %2792, %v2985_v12   ;;  %v3046_v38 = vpop.f32.mrf.mxu0 }
  0xd2   : > { %v2989_v13 = vpop.f32.mrf.mxu1 }
  0xd3   : > { %v3057_v43 = vpop.f32.mrf.mxu0 }
  0xd4   : > { %v2991_v14 = vpop.f32.mrf.mxu1 }
  0xd5   : > { %2794 = vset.pattern.permute.xlu1 %v2916_v1  ;;  %2795 = vset.pattern.permute.xlu0 %v2917_v2  ;;  %v3064_v47 = vpop.f32.mrf.mxu0 }
  0xd6   : > { %458 = vperm.xlu0 %2795, %v2989_v13   ;;  %505 = vperm.xlu1 %2794, %v2989_v13   ;;  %v2995_v15 = vpop.f32.mrf.mxu1 }
  0xd7   : > { %v3069_v51 = vpop.f32.mrf.mxu0 }
  0xd8   : > { %v2999_v16 = vpop.f32.mrf.mxu1 }
  0xd9   : > { %v3080_v56 = vpop.f32.mrf.mxu0 }
  0xda   : > { %2796 = vset.pattern.permute.xlu0 %v2916_v1  ;;  %513 = vperm.xlu1 %2794, %v2995_v15   ;;  %v3002_v17 = vpop.f32.mrf.mxu1 }
  0xdb   : > { %517 = vperm.xlu0 %2796, %v2991_v14   ;;  %v3089_v59 = vpop.f32.mrf.mxu0 }
  0xdc   : > { %v3006_v18 = vpop.f32.mrf.mxu1 }
  0xdd   : > { %v3096_v60 = vpop.f32.mrf.mxu0 }
  0xde   : > { %525 = vperm.xlu1 %2794, %v2999_v16   ;;  %v3009_v19 = vpop.f32.mrf.mxu1 }
  0xdf   : > { %2797 = vset.pattern.permute.xlu0 %v2917_v2  ;;  %v3102_v62 = vpop.f32.mrf.mxu0 }
  0xe0   : > { %473 = vperm.xlu0 %2797, %v2991_v14  }
  0xe2   : > { %521 = vperm.xlu1 %2794, %v3002_v17  }
  0xe4   : > { %468 = vperm.xlu0 %2797, %v2995_v15  }
  0xe6   : > { %2798 = vset.pattern.permute.xlu1 %v2917_v2 }
  0xe7   : > { %478 = vperm.xlu1 %2798, %v3002_v17  }
  0xe8   : > { %2801 = vset.pattern.permute.xlu0 %v2916_v1 }
  0xe9   : > { %529 = vperm.xlu0 %2801, %v3009_v19  }
  0xeb   : > { %2799 = vset.pattern.permute.xlu1 %v2916_v1  ;;  %v3107_v1 = vld [vmem:[%s3421_s1 + $0x8] sm:$0xff] }
  0xec   : > { %533 = vperm.xlu1 %2799, %v3006_v18  }
  0xed   : > { %2802 = vset.pattern.permute.xlu0 %v2917_v2 }
  0xee   : > { %488 = vperm.xlu0 %2802, %v3009_v19  }
  0xf0   : > { %2800 = vset.pattern.permute.xlu1 %v2917_v2 }
  0xf1   : > { %483 = vperm.xlu1 %2800, %v2999_v16  }
  0xf2   : > { %2803 = vset.pattern.permute.xlu0 %v2918_v61 }
  0xf5   : > { %493 = vperm.xlu1 %2800, %v3006_v18  }
  0xf9   : > { %2804 = vset.pattern.permute.xlu1 %v2918_v61 }
 0x14c   : > { %v464_v22 = vpop.permute.xlu1 %463  ;;  %v510_v23 = vpop.permute.xlu0 %509 }
 0x14d   : > { %v537_v24 = vsel %vm455_vm1, 1.0, %v510_v23  ;;  %v497_v30 = vsel %vm455_vm1, %v464_v22, 1.0 }
 0x14e   : > { %2666 = vmatprep.subr.msk.mxu0 %vm544_vm2, %v537_v24 }
 0x14f   : > { %2667 = vmatpush3.xpose.msk.msra.mxu0 %vm544_vm2, %v537_v24 }
 0x151   : > { %v459_v25 = vpop.permute.xlu0 %458  ;;  %v506_v26 = vpop.permute.xlu1 %505 }
 0x152   : > { %v496_v27 = vsel %vm455_vm1, %v459_v25, 1.0  ;;  %v536_v28 = vsel %vm455_vm1, 1.0, %v506_v26 }
 0x153   : > { %2668 = vmatprep.subr.msk.mxu0 %vm544_vm2, %v536_v28  ;;  %2670 = vmatprep.mubr.msk.f32.mxu0 %vm544_vm2, %v496_v27 }
 0x154   : > { %2669 = vmatpush3.xpose.msk.msra.mxu0 %vm544_vm2, %v536_v28 }
 0x155   : > { %v514_v29 = vpop.permute.xlu1 %513 }
 0x156   : > { %v518_v31 = vpop.permute.xlu0 %517  ;;  %v538_v33 = vsel %vm455_vm1, 1.0, %v514_v29 }
 0x157   : > { %v539_v32 = vsel %vm455_vm1, 1.0, %v518_v31  ;;  %2671 = vmatmul.mubr.msk.f32.vlgmr.msra.gmra.mxu0 %vm544_vm2, %v497_v30 }
 0x158   : > { %2673 = vmatprep.subr.msk.mxu1 %vm544_vm2, %v539_v32 }
 0x159   : > { %2674 = vmatpush3.xpose.msk.msra.mxu1 %vm544_vm2, %v539_v32  ;;  %v526_v34 = vpop.permute.xlu1 %525 }
 0x15a   : > { %v541_v35 = vsel %vm455_vm1, 1.0, %v526_v34  ;;  %2675 = vmatprep.subr.msk.mxu1 %vm544_vm2, %v538_v33 }
 0x15b   : > { %v474_v36 = vpop.permute.xlu0 %473  ;;  %2680 = vmatprep.subr.msk.mxu0 %vm544_vm2, %v541_v35 }
 0x15c   : > { %2681 = vmatpush3.xpose.msk.msra.mxu0 %vm544_vm2, %v541_v35  ;;  %v499_v42 = vsel %vm455_vm1, %v474_v36, 1.0 }
 0x15d   : > { %2676 = vmatpush3.xpose.msk.msra.mxu1 %vm544_vm2, %v538_v33  ;;  %v522_v37 = vpop.permute.xlu1 %521 }
 0x15e   : > { %v540_v39 = vsel %vm455_vm1, 1.0, %v522_v37 }
 0x15f   : > { %v469_v40 = vpop.permute.xlu0 %468  ;;  %2682 = vmatprep.subr.msk.mxu0 %vm544_vm2, %v540_v39 }
 0x160   : > { %v498_v41 = vsel %vm455_vm1, %v469_v40, 1.0  ;;  %2683 = vmatpush3.xpose.msk.msra.mxu0 %vm544_vm2, %v540_v39 }
 0x161   : > { %2677 = vmatprep.mubr.msk.f32.mxu1 %vm544_vm2, %v498_v41  ;;  %2694 = vmatprep.subr.mxu0 %v3046_v38 }
 0x162   : > { %2678 = vmatmul.mubr.msk.f32.vlgmr.msra.gmra.mxu1 %vm544_vm2, %v499_v42  ;;  %v479_v44 = vpop.permute.xlu1 %478 }
 0x163   : > { %v500_v45 = vsel %vm455_vm1, %v479_v44, 1.0 }
 0x164   : > { %2684 = vmatprep.mubr.msk.f32.mxu0 %vm544_vm2, %v500_v45  ;;  %v530_v46 = vpop.permute.xlu0 %529 }
 0x165   : > { %v542_v52 = vsel %vm455_vm1, 1.0, %v530_v46 }
 0x167   : > { %v534_v48 = vpop.permute.xlu1 %533 }
 0x168   : > { %v543_v49 = vsel %vm455_vm1, 1.0, %v534_v48 }
 0x169   : > { %2687 = vmatprep.subr.msk.mxu1 %vm544_vm2, %v543_v49  ;;  %v489_v50 = vpop.permute.xlu0 %488 }
 0x16a   : > { %v502_v53 = vsel %vm455_vm1, %v489_v50, 1.0  ;;  %2688 = vmatpush3.xpose.msk.msra.mxu1 %vm544_vm2, %v543_v49 }
 0x16b   : > { %2689 = vmatprep.subr.msk.mxu1 %vm544_vm2, %v542_v52  ;;  %2691 = vmatprep.mubr.msk.f32.mxu1 %vm544_vm2, %v502_v53 }
 0x16c   : > { %v484_v54 = vpop.permute.xlu1 %483 }
 0x16d   : > { %v501_v55 = vsel %vm455_vm1, %v484_v54, 1.0  ;;  %v2919_v54 = vmov 2  }
 0x16e   : > { %2685 = vmatmul.mubr.msk.f32.vlgmr.msra.gmra.mxu0 %vm544_vm2, %v501_v55  ;;  %2690 = vmatpush3.xpose.msk.msra.mxu1 %vm544_vm2, %v542_v52 }
 0x16f   : > { %2695 = vmatpush3.msra.mxu0 %v3046_v38  ;;  %2701 = vmatprep.subr.mxu1 %v3064_v47 }
 0x170   : > { %v494_v57 = vpop.permute.xlu1 %493  ;;  %2696 = vmatprep.subr.mxu0 %v3057_v43 }
 0x171   : > { %v503_v58 = vsel %vm455_vm1, %v494_v57, 1.0  ;;  %2697 = vmatpush3.msra.mxu0 %v3057_v43 }
 0x172   : > { %2692 = vmatmul.mubr.msk.f32.vlgmr.msra.gmra.mxu1 %vm544_vm2, %v503_v58  ;;  %2708 = vmatprep.subr.mxu0 %v3080_v56 }
 0x173   : > { %2702 = vmatpush3.msra.mxu1 %v3064_v47 }
 0x174   : > { %2703 = vmatprep.subr.mxu1 %v3069_v51 }
 0x175   : > { %2704 = vmatpush3.msra.mxu1 %v3069_v51 }
 0x176   : > { %2715 = vmatprep.subr.mxu1 %v3096_v60 }
 0x217   : > { %v2672_v63 = vpop.f32.mrf.mxu0 }
 0x218   : > { %vm894_vm3 = vcmp.gt.f32.partialorder %v2672_v63, 0.0  ;;  %v902_v0 = vmul.f32 0.2, %v2672_v63 }
 0x219   : > { %v623_v2 = vpop.f32.mrf.mxu0 }
 0x21a   : > { %vm893_vm4 = vcmp.gt.f32.partialorder %v623_v2, 0.0  ;;  %v901_v3 = vmul.f32 0.2, %v623_v2  ;;  %v910_v4 = vsel %vm894_vm3, %v2672_v63, %v902_v0 }
 0x21b   : > { %v3115_v6 = vadd.f32 %v910_v4, %v3107_v1 }
 0x21c   : > { %v909_v7 = vsel %vm893_vm4, %v623_v2, %v901_v3 }
 0x21d   : > { %v929_v8 = vsel %vm925_vm5, %v3115_v6, -inf  ;;  %v3120_v9 = vadd.f32 %v909_v7, %v3112_v5 }
 0x21e   : > { %930 = vmax.xlane.f32.xlu0 %v929_v8 }
 0x21f   : > { %v926_v10 = vsel %vm925_vm5, %v3120_v9, -inf }
 0x220   : > { %927 = vmax.xlane.f32.xlu1 %v926_v10 }
 0x222   : > { %v2679_v11 = vpop.f32.mrf.mxu1 }
 0x223   : > { %vm896_vm6 = vcmp.gt.f32.partialorder %v2679_v11, 0.0  ;;  %v904_v20 = vmul.f32 0.2, %v2679_v11 }
 0x224   : > { %v710_v22 = vpop.f32.mrf.mxu1 }
 0x225   : > { %vm895_vm7 = vcmp.gt.f32.partialorder %v710_v22, 0.0  ;;  %v903_v23 = vmul.f32 0.2, %v710_v22  ;;  %v912_v24 = vsel %vm896_vm6, %v2679_v11, %v904_v20 }
 0x226   : > { %v920_v25 = vadd.f32 %v912_v24, %v3107_v1 }
 0x227   : > { %v911_v26 = vsel %vm895_vm7, %v710_v22, %v903_v23 }
 0x228   : > { %v935_v27 = vsel %vm925_vm5, %v920_v25, -inf  ;;  %v919_v28 = vadd.f32 %v911_v26, %v3112_v5 }
 0x229   : > { %936 = vmax.xlane.f32.xlu1 %v935_v27 }
 0x22a   : > { %v932_v29 = vsel %vm925_vm5, %v919_v28, -inf }
 0x22b   : > { %933 = vmax.xlane.f32.xlu0 %v932_v29 }
 0x22e   : > { %v2686_v30 = vpop.f32.mrf.mxu0 }
 0x22f   : > { %vm898_vm8 = vcmp.gt.f32.partialorder %v2686_v30, 0.0  ;;  %v906_v31 = vmul.f32 0.2, %v2686_v30 }
 0x230   : > { %v797_v32 = vpop.f32.mrf.mxu0 }
 0x231   : > { %vm897_vm9 = vcmp.gt.f32.partialorder %v797_v32, 0.0  ;;  %v905_v33 = vmul.f32 0.2, %v797_v32  ;;  %v914_v34 = vsel %vm898_vm8, %v2686_v30, %v906_v31 }
 0x232   : > { %v2693_v35 = vpop.f32.mrf.mxu1  ;;  %v922_v36 = vadd.f32 %v914_v34, %v3107_v1 }
 0x233   : > { %vm900_vm10 = vcmp.gt.f32.partialorder %v2693_v35, 0.0  ;;  %v908_v37 = vmul.f32 0.2, %v2693_v35  ;;  %v913_v39 = vsel %vm897_vm9, %v797_v32, %v905_v33 }
 0x234   : > { %v884_v40 = vpop.f32.mrf.mxu1  ;;  %v941_v41 = vsel %vm925_vm5, %v922_v36, -inf  ;;  %v921_v42 = vadd.f32 %v913_v39, %v3112_v5 }
 0x235   : > { %vm899_vm11 = vcmp.gt.f32.partialorder %v884_v40, 0.0  ;;  %v907_v44 = vmul.f32 0.2, %v884_v40  ;;  %942 = vmax.xlane.f32.xlu1 %v941_v41  ;;  %v916_v45 = vsel %vm900_vm10, %v2693_v35, %v908_v37 }
 0x236   : > { %v938_v46 = vsel %vm925_vm5, %v921_v42, -inf  ;;  %v924_v48 = vadd.f32 %v916_v45, %v3107_v1 }
 0x237   : > { %939 = vmax.xlane.f32.xlu0 %v938_v46  ;;  %v915_v49 = vsel %vm899_vm11, %v884_v40, %v907_v44 }
 0x238   : > { %v947_v50 = vsel %vm925_vm5, %v924_v48, -inf  ;;  %v923_v52 = vadd.f32 %v915_v49, %v3112_v5 }
 0x239   : > { %948 = vmax.xlane.f32.xlu1 %v947_v50 }
 0x23a   : > { %v944_v53 = vsel %vm925_vm5, %v923_v52, -inf }
 0x23b   : > { %945 = vmax.xlane.f32.xlu0 %v944_v53 }
 0x24a   : > { %1447 = vperm.xlu1 %2804, %v2991_v14  }
 0x24e   : > { %1435 = vperm.xlu1 %2804, %v2989_v13  }
 0x251   : > { %1439 = vperm.xlu0 %2803, %v2985_v12  }
 0x252   : > { %1443 = vperm.xlu1 %2804, %v2995_v15  }
 0x255   : > { %2809 = vset.pattern.permute.xlu0 %v2919_v54 }
 0x256   : > { %2805 = vset.pattern.permute.xlu1 %v2919_v54 }
 0x257   : > { %1395 = vperm.xlu1 %2805, %v2989_v13  }
 0x25b   : > { %2806 = vset.pattern.permute.xlu1 %v2918_v61 }
 0x25c   : > { %1455 = vperm.xlu1 %2806, %v2999_v16  }
 0x260   : > { %2807 = vset.pattern.permute.xlu1 %v2919_v54 }
 0x261   : > { %1399 = vperm.xlu1 %2807, %v2985_v12  }
 0x265   : > { %1403 = vperm.xlu1 %2807, %v2995_v15  }
 0x269   : > { %2808 = vset.pattern.permute.xlu1 %v2918_v61 }
 0x26a   : > { %1463 = vperm.xlu1 %2808, %v3006_v18  }
 0x2a7   : > { %v931_v55 = vpop.xlane.xlu0 %930 }
 0x2a8   : > { %v951_v57 = vsub.f32 %v3115_v6, %v931_v55 }
 0x2a9   : > { %v928_v58 = vpop.xlane.xlu1 %927 }
 0x2aa   : > { %v960_v63 = vmul.f32 1.442695, %v951_v57  ;;  %v950_v13 = vsub.f32 %v3120_v9, %v928_v58 }
 0x2ac   : > { %2812 = vpow2.f32 %v960_v63  ;;  %v958_v0 = vmul.f32 1.442695, %v950_v13 }
 0x2ae   : > { %2814 = vpow2.f32 %v958_v0 }
 0x2b2   : > { %v937_v2 = vpop.xlane.xlu1 %936 }
 0x2b3   : > { %v953_v3 = vsub.f32 %v920_v25, %v937_v2 }
 0x2b4   : > { %v934_v4 = vpop.xlane.xlu0 %933 }
 0x2b5   : > { %v964_v12 = vmul.f32 1.442695, %v953_v3  ;;  %v952_v7 = vsub.f32 %v919_v28, %v934_v4 }
 0x2b7   : > { %2816 = vpow2.f32 %v964_v12  ;;  %v962_v15 = vmul.f32 1.442695, %v952_v7 }
 0x2b9   : > { %v3152_v8 = vpop.eup %2812  ;;  %2818 = vpow2.f32 %v962_v15 }
 0x2ba   : > { %v977_v6 = vsel %vm925_vm5, %v3152_v8, 0.0 }
 0x2bb   : > { %v3156_v10 = vpop.eup %2814  ;;  %978 = vadd.xlane.f32.xlu1 %v977_v6 }
 0x2bc   : > { %v974_v9 = vsel %vm925_vm5, %v3156_v10, 0.0 }
 0x2bd   : > { %975 = vadd.xlane.f32.xlu0 %v974_v9 }
 0x2be   : > { %v943_v11 = vpop.xlane.xlu1 %942 }
 0x2bf   : > { %v955_v20 = vsub.f32 %v922_v36, %v943_v11 }
 0x2c0   : > { %v940_v22 = vpop.xlane.xlu0 %939 }
 0x2c1   : > { %v968_v23 = vmul.f32 1.442695, %v955_v20  ;;  %v954_v24 = vsub.f32 %v921_v42, %v940_v22 }
 0x2c2   : > { %v949_v25 = vpop.xlane.xlu1 %948 }
 0x2c3   : > { %2820 = vpow2.f32 %v968_v23  ;;  %v966_v26 = vmul.f32 1.442695, %v954_v24  ;;  %v957_v27 = vsub.f32 %v924_v48, %v949_v25 }
 0x2c4   : > { %v3160_v28 = vpop.eup %2816  ;;  %v946_v29 = vpop.xlane.xlu0 %945 }
 0x2c5   : > { %2822 = vpow2.f32 %v966_v26  ;;  %v972_v30 = vmul.f32 1.442695, %v957_v27  ;;  %v956_v31 = vsub.f32 %v923_v52, %v946_v29  ;;  %v983_v32 = vsel %vm925_vm5, %v3160_v28, 0.0 }
 0x2c6   : > { %v3164_v33 = vpop.eup %2818  ;;  %984 = vadd.xlane.f32.xlu1 %v983_v32  ;;  %v1448_v46 = vpop.permute.xlu1 %1447 }
 0x2c7   : > { %2824 = vpow2.f32 %v972_v30  ;;  %v970_v34 = vmul.f32 1.442695, %v956_v31  ;;  %v980_v35 = vsel %vm925_vm5, %v3164_v33, 0.0  ;;  %v1469_v6 = vsel %vm455_vm1, 1.0, %v1448_v46 }
 0x2c8   : > { %981 = vadd.xlane.f32.xlu0 %v980_v35 }
 0x2c9   : > { %2826 = vpow2.f32 %v970_v34 }
 0x2ca   : > { %v1436_v48 = vpop.permute.xlu1 %1435 }
 0x2cb   : > { %v1466_v27 = vsel %vm455_vm1, 1.0, %v1436_v48 }
 0x2ce   : > { %v3193_v49 = vpop.permute.xlu1 %1443 }
 0x2cf   : > { %v1468_v32 = vsel %vm455_vm1, 1.0, %v3193_v49 }
 0x2d0   : > { %v3168_v36 = vpop.eup %2820 }
 0x2d1   : > { %v989_v37 = vsel %vm925_vm5, %v3168_v36, 0.0 }
 0x2d2   : > { %v3172_v39 = vpop.eup %2822  ;;  %990 = vadd.xlane.f32.xlu1 %v989_v37  ;;  %v1396_v50 = vpop.permute.xlu1 %1395 }
 0x2d3   : > { %v986_v40 = vsel %vm925_vm5, %v3172_v39, 0.0  ;;  %v1426_v26 = vsel %vm455_vm1, %v1396_v50, 1.0 }
 0x2d4   : > { %v3176_v41 = vpop.eup %2824  ;;  %987 = vadd.xlane.f32.xlu0 %v986_v40 }
 0x2d5   : > { %v995_v42 = vsel %vm925_vm5, %v3176_v41, 0.0 }
 0x2d6   : > { %v3180_v44 = vpop.eup %2826  ;;  %996 = vadd.xlane.f32.xlu1 %v995_v42 }
 0x2d7   : > { %v992_v45 = vsel %vm925_vm5, %v3180_v44, 0.0  ;;  %v3195_v52 = vpop.permute.xlu1 %1455 }
 0x2d8   : > { %993 = vadd.xlane.f32.xlu0 %v992_v45  ;;  %v1471_v34 = vsel %vm455_vm1, 1.0, %v3195_v52 }
 0x2e7   : > { %1451 = vperm.xlu1 %2808, %v3002_v17  }
 0x2eb   : > { %1459 = vperm.xlu1 %2808, %v3009_v19  }
 0x2ee   : > { %1407 = vperm.xlu0 %2809, %v2991_v14   ;;  %v3197_v14 = vpop.permute.xlu1 %1399 }
 0x2ef   : > { %2810 = vset.pattern.permute.xlu1 %v2919_v54  ;;  %v1427_v35 = vsel %vm455_vm1, %v3197_v14, 1.0 }
 0x2f0   : > { %1415 = vperm.xlu1 %2810, %v2999_v16  }
 0x2f2   : > { %1411 = vperm.xlu0 %2809, %v3002_v17   ;;  %v3199_v53 = vpop.permute.xlu1 %1403  ;;  %v1440_v17 = vpop.permute.xlu0 %1439 }
 0x2f3   : > { %v1467_v13 = vsel %vm455_vm1, 1.0, %v1440_v17 }
 0x2f4   : > { %1423 = vperm.xlu1 %2810, %v3006_v18  }
 0x2f6   : > { %1419 = vperm.xlu0 %2809, %v3009_v19   ;;  %v3201_v16 = vpop.permute.xlu1 %1463 }
 0x2fa   : > { %2811 = vset.pattern.permute.xlu0 %v2918_v61 }
 0x344   : > { %v979_v54 = vpop.xlane.xlu1 %978 }
 0x345   : > { %2828 = vrcp.f32 %v979_v54 }
 0x346   : > { %v976_v18 = vpop.xlane.xlu0 %975 }
 0x347   : > { %2830 = vrcp.f32 %v976_v18 }
 0x34f   : > { %v985_v19 = vpop.xlane.xlu1 %984 }
 0x350   : > { %2832 = vrcp.f32 %v985_v19 }
 0x351   : > { %v982_v61 = vpop.xlane.xlu0 %981 }
 0x352   : > { %2834 = vrcp.f32 %v982_v61  ;;  %v2829_v55 = vpop.eup %2828 }
 0x353   : > { %v1015_v63 = vmul.f32 %v2829_v55, %v3152_v8 }
 0x354   : > { %v2831_v57 = vpop.eup %2830 }
 0x355   : > { %v1014_v58 = vmul.f32 %v2831_v57, %v3156_v10 }
 0x357   : > { %2698 = vmatprep.mubr.msk.f32.mxu0 %vm925_vm5, %v1014_v58 }
 0x358   : > { %2699 = vmatmul.mubr.msk.f32.vlgmr.msra.gmra.mxu0 %vm925_vm5, %v1015_v63 }
 0x359   : > { %2709 = vmatpush3.msra.mxu0 %v3080_v56 }
 0x35a   : > { %2710 = vmatprep.subr.mxu0 %v3089_v59 }
 0x35b   : > { %2711 = vmatpush3.msra.mxu0 %v3089_v59  ;;  %v991_v0 = vpop.xlane.xlu1 %990 }
 0x35c   : > { %2722 = vmatprep.subr.msk.mxu0 %vm544_vm2, %v1467_v13  ;;  %2836 = vrcp.f32 %v991_v0 }
 0x35d   : > { %v988_v2 = vpop.xlane.xlu0 %987  ;;  %v2833_v3 = vpop.eup %2832 }
 0x35e   : > { %2838 = vrcp.f32 %v988_v2  ;;  %v1017_v8 = vmul.f32 %v2833_v3, %v3160_v28 }
 0x35f   : > { %v2835_v4 = vpop.eup %2834  ;;  %v997_v12 = vpop.xlane.xlu1 %996 }
 0x360   : > { %v1016_v7 = vmul.f32 %v2835_v4, %v3164_v33  ;;  %2840 = vrcp.f32 %v997_v12  ;;  %v1428_v33 = vsel %vm455_vm1, %v3199_v53, 1.0 }
 0x361   : > { %v994_v15 = vpop.xlane.xlu0 %993 }
 0x362   : > { %2842 = vrcp.f32 %v994_v15  ;;  %2705 = vmatprep.mubr.msk.f32.mxu1 %vm925_vm5, %v1016_v7 }
 0x363   : > { %2706 = vmatmul.mubr.msk.f32.vlgmr.msra.gmra.mxu1 %vm925_vm5, %v1017_v8  ;;  %v1452_v20 = vpop.permute.xlu1 %1451 }
 0x364   : > { %2716 = vmatpush3.msra.mxu1 %v3096_v60 }
 0x365   : > { %2717 = vmatprep.subr.mxu1 %v3102_v62 }
 0x366   : > { %2718 = vmatpush3.msra.mxu1 %v3102_v62 }
 0x367   : > { %2729 = vmatprep.subr.msk.mxu1 %vm544_vm2, %v1469_v6  ;;  %v1460_v30 = vpop.permute.xlu1 %1459 }
 0x369   : > { %v2837_v10 = vpop.eup %2836  ;;  %v1408_v22 = vpop.permute.xlu0 %1407 }
 0x36a   : > { %v1019_v23 = vmul.f32 %v2837_v10, %v3168_v36  ;;  %v1470_v36 = vsel %vm455_vm1, 1.0, %v1452_v20  ;;  %v1429_v42 = vsel %vm455_vm1, %v1408_v22, 1.0 }
 0x36b   : > { %v2839_v9 = vpop.eup %2838  ;;  %v1416_v40 = vpop.permute.xlu1 %1415 }
 0x36c   : > { %v1018_v11 = vmul.f32 %v2839_v9, %v3172_v39  ;;  %v1473_v39 = vsel %vm455_vm1, 1.0, %v3201_v16  ;;  %v1431_v46 = vsel %vm455_vm1, %v1416_v40, 1.0 }
 0x36d   : > { %v2841_v24 = vpop.eup %2840  ;;  %v1412_v31 = vpop.permute.xlu0 %1411 }
 0x36e   : > { %2712 = vmatprep.mubr.msk.f32.mxu0 %vm925_vm5, %v1018_v11  ;;  %v1021_v29 = vmul.f32 %v2841_v24, %v3176_v41  ;;  %v1430_v37 = vsel %vm455_vm1, %v1412_v31, 1.0 }
 0x36f   : > { %v2843_v25 = vpop.eup %2842  ;;  %2713 = vmatmul.mubr.msk.f32.vlgmr.msra.gmra.mxu0 %vm925_vm5, %v1019_v23  ;;  %v1424_v48 = vpop.permute.xlu1 %1423 }
 0x370   : > { %2723 = vmatpush3.xpose.msk.msra.mxu0 %vm544_vm2, %v1467_v13  ;;  %2726 = vmatprep.mubr.msk.f32.mxu0 %vm544_vm2, %v1426_v26  ;;  %v1020_v28 = vmul.f32 %v2843_v25, %v3180_v44  ;;  %v1472_v44 = vsel %vm455_vm1, 1.0, %v1460_v30  ;;  %v1433_v49 = vsel %vm455_vm1, %v1424_v48, 1.0 }
 0x371   : > { %2724 = vmatprep.subr.msk.mxu0 %vm544_vm2, %v1466_v27  ;;  %v1420_v41 = vpop.permute.xlu0 %1419 }
 0x372   : > { %2719 = vmatprep.mubr.msk.f32.mxu1 %vm925_vm5, %v1020_v28  ;;  %v1432_v45 = vsel %vm455_vm1, %v1420_v41, 1.0 }
 0x373   : > { %2720 = vmatmul.mubr.msk.f32.vlgmr.msra.gmra.mxu1 %vm925_vm5, %v1021_v29 }
 0x374   : > { %2725 = vmatpush3.xpose.msk.msra.mxu0 %vm544_vm2, %v1466_v27  ;;  %2730 = vmatpush3.xpose.msk.msra.mxu1 %vm544_vm2, %v1469_v6 }
 0x375   : > { %2731 = vmatprep.subr.msk.mxu1 %vm544_vm2, %v1468_v32  ;;  %2733 = vmatprep.mubr.msk.f32.mxu1 %vm544_vm2, %v1428_v33 }
 0x376   : > { %2736 = vmatprep.subr.msk.mxu0 %vm544_vm2, %v1471_v34 }
 0x377   : > { %2727 = vmatmul.mubr.msk.f32.vlgmr.msra.gmra.mxu0 %vm544_vm2, %v1427_v35 }
 0x378   : > { %2732 = vmatpush3.xpose.msk.msra.mxu1 %vm544_vm2, %v1468_v32  ;;  %2737 = vmatpush3.xpose.msk.msra.mxu0 %vm544_vm2, %v1471_v34 }
 0x379   : > { %2740 = vmatprep.mubr.msk.f32.mxu0 %vm544_vm2, %v1430_v37  ;;  %2738 = vmatprep.subr.msk.mxu0 %vm544_vm2, %v1470_v36 }
 0x37a   : > { %2743 = vmatprep.subr.msk.mxu1 %vm544_vm2, %v1473_v39 }
 0x37b   : > { %2734 = vmatmul.mubr.msk.f32.vlgmr.msra.gmra.mxu1 %vm544_vm2, %v1429_v42 }
 0x37c   : > { %2739 = vmatpush3.xpose.msk.msra.mxu0 %vm544_vm2, %v1470_v36  ;;  %2744 = vmatpush3.xpose.msk.msra.mxu1 %vm544_vm2, %v1473_v39 }
 0x37d   : > { %2747 = vmatprep.mubr.msk.f32.mxu1 %vm544_vm2, %v1432_v45  ;;  %2745 = vmatprep.subr.msk.mxu1 %vm544_vm2, %v1472_v44 }
 0x37f   : > { %2741 = vmatmul.mubr.msk.f32.vlgmr.msra.gmra.mxu0 %vm544_vm2, %v1431_v46 }
 0x380   : > { %2746 = vmatpush3.xpose.msk.msra.mxu1 %vm544_vm2, %v1472_v44 }
 0x383   : > { %2748 = vmatmul.mubr.msk.f32.vlgmr.msra.gmra.mxu1 %vm544_vm2, %v1433_v49 }
 0x418   : > { %v3286_v50 = vpop.f32.mrf.mxu0 }
 0x41a   : > { %v3288_v52 = vpop.f32.mrf.mxu0 }
 0x423   : > { %v3290_v14 = vpop.f32.mrf.mxu1 }
 0x425   : > { %v3294_v16 = vpop.f32.mrf.mxu1 }
 0x42f   : > { %v3292_v53 = vpop.f32.mrf.mxu0 }
 0x431   : > { %v3296_v17 = vpop.f32.mrf.mxu0 }
 0x433   : > { %v3298_v54 = vpop.f32.mrf.mxu1 }
 0x435   : > { %v3300_v21 = vpop.f32.mrf.mxu1 }
 0x437   : > { %v2728_v18 = vpop.f32.mrf.mxu0 }
 0x438   : > { %vm1823_vm12 = vcmp.gt.f32.partialorder %v2728_v18, 0.0  ;;  %v1831_v19 = vmul.f32 0.2, %v2728_v18 }
 0x439   : > { %v1552_v61 = vpop.f32.mrf.mxu0 }
 0x43a   : > { %vm1822_vm13 = vcmp.gt.f32.partialorder %v1552_v61, 0.0  ;;  %v1830_v55 = vmul.f32 0.2, %v1552_v61  ;;  %v1839_v58 = vsel %vm1823_vm12, %v2728_v18, %v1831_v19 }
 0x43b   : > { %v2735_v57 = vpop.f32.mrf.mxu1  ;;  %v1847_v13 = vadd.f32 %v1839_v58, %v3107_v1 }
 0x43c   : > { %vm1825_vm14 = vcmp.gt.f32.partialorder %v2735_v57, 0.0  ;;  %v1833_v63 = vmul.f32 0.2, %v2735_v57  ;;  %v1838_v0 = vsel %vm1822_vm13, %v1552_v61, %v1830_v55  ;;  %vm1347_vm13 = vcmp.gt.f32.partialorder %v3286_v50, 0.0 }
 0x43d   : > { %v1639_v2 = vpop.f32.mrf.mxu1  ;;  %v1846_v3 = vadd.f32 %v1838_v0, %v3112_v5  ;;  %v1857_v12 = vsel %vm925_vm5, %v1847_v13, -inf }
 0x43e   : > { %vm1824_vm15 = vcmp.gt.f32.partialorder %v1639_v2, 0.0  ;;  %v1832_v4 = vmul.f32 0.2, %v1639_v2  ;;  %v1841_v7 = vsel %vm1825_vm14, %v2735_v57, %v1833_v63  ;;  %1858 = vmax.xlane.f32.xlu1 %v1857_v12  ;;  %vm2394_vm14 = vcmask 261120  }
 0x43f   : > { %v2742_v15 = vpop.f32.mrf.mxu0  ;;  %v1854_v8 = vsel %vm925_vm5, %v1846_v3, -inf  ;;  %v1849_v6 = vadd.f32 %v1841_v7, %v3107_v1 }
 0x440   : > { %v1835_v10 = vmul.f32 0.2, %v2742_v15  ;;  %1855 = vmax.xlane.f32.xlu0 %v1854_v8  ;;  %v1840_v9 = vsel %vm1824_vm15, %v1639_v2, %v1832_v4  ;;  %vm1827_vm0 = vcmp.gt.f32.partialorder %v2742_v15, 0.0  ;;  %vm1346_vm15 = vcmp.gt.f32.partialorder %v3288_v52, 0.0 }
 0x441   : > { %v1726_v11 = vpop.f32.mrf.mxu0  ;;  %v1863_v23 = vsel %vm925_vm5, %v1849_v6, -inf  ;;  %v1848_v24 = vadd.f32 %v1840_v9, %v3112_v5 }
 0x442   : > { %vm1826_vm1 = vcmp.gt.f32.partialorder %v1726_v11, 0.0  ;;  %v1834_v20 = vmul.f32 0.2, %v1726_v11  ;;  %v1843_v26 = vsel %vm1827_vm0, %v2742_v15, %v1835_v10  ;;  %vm1349_vm0 = vcmp.gt.f32.partialorder %v3290_v14, 0.0 }
 0x443   : > { %v2749_v22 = vpop.f32.mrf.mxu1  ;;  %v1860_v30 = vsel %vm925_vm5, %v1848_v24, -inf  ;;  %v1851_v32 = vadd.f32 %v1843_v26, %v3107_v1 }
 0x444   : > { %v1837_v25 = vmul.f32 0.2, %v2749_v22  ;;  %1864 = vmax.xlane.f32.xlu0 %v1863_v23  ;;  %vm1829_vm2 = vcmp.gt.f32.partialorder %v2749_v22, 0.0  ;;  %v1842_v28 = vsel %vm1826_vm1, %v1726_v11, %v1834_v20  ;;  %vm1348_vm1 = vcmp.gt.f32.partialorder %v3294_v16, 0.0 }
 0x445   : > { %v1813_v27 = vpop.f32.mrf.mxu1  ;;  %v1850_v31 = vadd.f32 %v1842_v28, %v3112_v5  ;;  %v1869_v37 = vsel %vm925_vm5, %v1851_v32, -inf }
 0x446   : > { %vm1828_vm3 = vcmp.gt.f32.partialorder %v1813_v27, 0.0  ;;  %v1836_v29 = vmul.f32 0.2, %v1813_v27  ;;  %v1845_v34 = vsel %vm1829_vm2, %v2749_v22, %v1837_v25  ;;  %vm1351_vm2 = vcmp.gt.f32.partialorder %v3292_v53, 0.0 }
 0x447   : > { %v1866_v35 = vsel %vm925_vm5, %v1850_v31, -inf  ;;  %v1853_v40 = vadd.f32 %v1845_v34, %v3107_v1 }
 0x448   : > { %1861 = vmax.xlane.f32.xlu0 %v1860_v30  ;;  %v1844_v33 = vsel %vm1828_vm3, %v1813_v27, %v1836_v29  ;;  %1867 = vmax.xlane.f32.xlu1 %v1866_v35  ;;  %vm1350_vm3 = vcmp.gt.f32.partialorder %v3296_v17, 0.0 }
 0x449   : > { %v1852_v36 = vadd.f32 %v1844_v33, %v3112_v5  ;;  %v1875_v41 = vsel %vm925_vm5, %v1853_v40, -inf }
 0x44b   : > { %v1872_v39 = vsel %vm925_vm5, %v1852_v36, -inf }
 0x44c   : > { %1870 = vmax.xlane.f32.xlu0 %v1869_v37  ;;  %1873 = vmax.xlane.f32.xlu1 %v1872_v39 }
 0x450   : > { %1876 = vmax.xlane.f32.xlu0 %v1875_v41 }
 0x45d   : > { %1954 = vrot.lane.b32.xlu1 %v3046_v38, %s2920_s30 }
 0x461   : > { %1952 = vrot.lane.b32.xlu1 %v3057_v43, %s2920_s30 }
 0x465   : > { %2041 = vrot.lane.b32.xlu1 %v3069_v51, %s2920_s30 }
 0x466   : > { %2043 = vrot.lane.b32.xlu0 %v3064_v47, %s2920_s30 }
 0x469   : > { %2221 = vrot.lane.b32.xlu1 %v3096_v60, %s2920_s30 }
 0x46a   : > { %2132 = vrot.lane.b32.xlu0 %v3080_v56, %s2920_s30 }
 0x4c7   : > { %v1859_v1 = vpop.xlane.xlu1 %1858 }
 0x4c8   : > { %v1879_v5 = vsub.f32 %v1847_v13, %v1859_v1 }
 0x4c9   : > { %v1856_v42 = vpop.xlane.xlu0 %1855 }
 0x4ca   : > { %v1878_v44 = vsub.f32 %v1846_v3, %v1856_v42  ;;  %v1888_v38 = vmul.f32 1.442695, %v1879_v5 }
 0x4cc   : > { %v1886_v45 = vmul.f32 1.442695, %v1878_v44  ;;  %2844 = vpow2.f32 %v1888_v38 }
 0x4cd   : > { %v1865_v43 = vpop.xlane.xlu0 %1864 }
 0x4ce   : > { %2846 = vpow2.f32 %v1886_v45  ;;  %v1881_v46 = vsub.f32 %v1849_v6, %v1865_v43 }
 0x4d0   : > { %v1892_v47 = vmul.f32 1.442695, %v1881_v46 }
 0x4d1   : > { %v1862_v48 = vpop.xlane.xlu0 %1861  ;;  %v1868_v49 = vpop.xlane.xlu1 %1867 }
 0x4d2   : > { %2848 = vpow2.f32 %v1892_v47  ;;  %v1880_v51 = vsub.f32 %v1848_v24, %v1862_v48  ;;  %v1882_v18 = vsub.f32 %v1850_v31, %v1868_v49 }
 0x4d4   : > { %v1890_v56 = vmul.f32 1.442695, %v1880_v51  ;;  %v1894_v61 = vmul.f32 1.442695, %v1882_v18 }
 0x4d5   : > { %v1871_v19 = vpop.xlane.xlu0 %1870  ;;  %v1874_v55 = vpop.xlane.xlu1 %1873 }
 0x4d6   : > { %2850 = vpow2.f32 %v1890_v56  ;;  %v1883_v60 = vsub.f32 %v1851_v32, %v1871_v19  ;;  %v1884_v57 = vsub.f32 %v1852_v36, %v1874_v55 }
 0x4d7   : > { %2852 = vpow2.f32 %v1894_v61 }
 0x4d8   : > { %v1896_v58 = vmul.f32 1.442695, %v1883_v60  ;;  %v1898_v0 = vmul.f32 1.442695, %v1884_v57 }
 0x4d9   : > { %v1877_v63 = vpop.xlane.xlu0 %1876  ;;  %v3330_v13 = vpop.eup %2844 }
 0x4da   : > { %2854 = vpow2.f32 %v1896_v58  ;;  %v1885_v2 = vsub.f32 %v1853_v40, %v1877_v63  ;;  %v1955_v4 = vpop.permute.xlu1 %1954  ;;  %v1905_v12 = vsel %vm925_vm5, %v3330_v13, 0.0 }
 0x4db   : > { %v2847_v3 = vpop.eup %2846  ;;  %2856 = vpow2.f32 %v1898_v0  ;;  %2750 = vmatprep.subr.mxu0 %v1955_v4  ;;  %1906 = vadd.xlane.f32.xlu0 %v1905_v12 }
 0x4dc   : > { %v1900_v7 = vmul.f32 1.442695, %v1885_v2  ;;  %v1902_v15 = vsel %vm925_vm5, %v2847_v3, 0.0  ;;  %2751 = vmatpush3.msra.mxu0 %v1955_v4 }
 0x4dd   : > { %1903 = vadd.xlane.f32.xlu1 %v1902_v15  ;;  %v2044_v8 = vpop.permute.xlu0 %2043 }
 0x4de   : > { %2858 = vpow2.f32 %v1900_v7  ;;  %2757 = vmatprep.subr.mxu1 %v2044_v8  ;;  %v1953_v10 = vpop.permute.xlu1 %1952 }
 0x4df   : > { %v2849_v6 = vpop.eup %2848  ;;  %2758 = vmatpush3.msra.mxu1 %v2044_v8  ;;  %2752 = vmatprep.subr.mxu0 %v1953_v10 }
 0x4e0   : > { %v1911_v9 = vsel %vm925_vm5, %v2849_v6, 0.0  ;;  %2753 = vmatpush3.msra.mxu0 %v1953_v10 }
 0x4e1   : > { %1912 = vadd.xlane.f32.xlu0 %v1911_v9  ;;  %v2133_v11 = vpop.permute.xlu0 %2132 }
 0x4e2   : > { %2764 = vmatprep.subr.mxu0 %v2133_v11  ;;  %v2042_v22 = vpop.permute.xlu1 %2041 }
 0x4e3   : > { %v2851_v20 = vpop.eup %2850  ;;  %2759 = vmatprep.subr.mxu1 %v2042_v22 }
 0x4e4   : > { %v1908_v23 = vsel %vm925_vm5, %v2851_v20, 0.0  ;;  %v2853_v24 = vpop.eup %2852  ;;  %2760 = vmatpush3.msra.mxu1 %v2042_v22 }
 0x4e5   : > { %1909 = vadd.xlane.f32.xlu1 %v1908_v23  ;;  %v1914_v27 = vsel %vm925_vm5, %v2853_v24, 0.0 }
 0x4e6   : > { %v2222_v26 = vpop.permute.xlu1 %2221 }
 0x4e7   : > { %v2855_v25 = vpop.eup %2854  ;;  %2771 = vmatprep.subr.mxu1 %v2222_v26 }
 0x4e8   : > { %v1917_v28 = vsel %vm925_vm5, %v2855_v25, 0.0  ;;  %v2857_v29 = vpop.eup %2856 }
 0x4e9   : > { %1915 = vadd.xlane.f32.xlu1 %v1914_v27  ;;  %1918 = vadd.xlane.f32.xlu0 %v1917_v28  ;;  %v1920_v31 = vsel %vm925_vm5, %v2857_v29, 0.0 }
 0x4eb   : > { %v2859_v30 = vpop.eup %2858 }
 0x4ec   : > { %v1923_v32 = vsel %vm925_vm5, %v2859_v30, 0.0 }
 0x4ed   : > { %1921 = vadd.xlane.f32.xlu1 %v1920_v31  ;;  %1924 = vadd.xlane.f32.xlu0 %v1923_v32 }
 0x4fe   : > { %2219 = vrot.lane.b32.xlu1 %v3102_v62, %s2920_s30 }
 0x503   : > { %2130 = vrot.lane.b32.xlu0 %v3089_v59, %s2920_s30 }
 0x564   : > { %v1907_v33 = vpop.xlane.xlu0 %1906 }
 0x565   : > { %2860 = vrcp.f32 %v1907_v33 }
 0x566   : > { %v1904_v34 = vpop.xlane.xlu1 %1903 }
 0x567   : > { %2862 = vrcp.f32 %v1904_v34 }
 0x56a   : > { %v1913_v35 = vpop.xlane.xlu0 %1912 }
 0x56b   : > { %2864 = vrcp.f32 %v1913_v35 }
 0x56e   : > { %v1910_v36 = vpop.xlane.xlu1 %1909 }
 0x56f   : > { %2866 = vrcp.f32 %v1910_v36 }
 0x572   : > { %v1916_v37 = vpop.xlane.xlu1 %1915  ;;  %v1919_v39 = vpop.xlane.xlu0 %1918 }
 0x573   : > { %v2861_v40 = vpop.eup %2860  ;;  %2868 = vrcp.f32 %v1916_v37 }
 0x574   : > { %v2863_v41 = vpop.eup %2862  ;;  %2870 = vrcp.f32 %v1919_v39  ;;  %v1943_v42 = vmul.f32 %v2861_v40, %v3330_v13 }
 0x575   : > { %v1942_v1 = vmul.f32 %v2863_v41, %v2847_v3 }
 0x576   : > { %v1922_v5 = vpop.xlane.xlu1 %1921  ;;  %v1925_v62 = vpop.xlane.xlu0 %1924 }
 0x577   : > { %2872 = vrcp.f32 %v1922_v5  ;;  %2754 = vmatprep.mubr.msk.f32.mxu0 %vm925_vm5, %v1942_v1 }
 0x578   : > { %2874 = vrcp.f32 %v1925_v62  ;;  %2755 = vmatmul.mubr.msk.f32.vlgmr.msra.gmra.mxu0 %vm925_vm5, %v1943_v42  ;;  %v2865_v44 = vpop.eup %2864 }
 0x579   : > { %2765 = vmatpush3.msra.mxu0 %v2133_v11  ;;  %v1945_v43 = vmul.f32 %v2865_v44, %v2849_v6 }
 0x57a   : > { %v2131_v59 = vpop.permute.xlu0 %2130  ;;  %v2220_v48 = vpop.permute.xlu1 %2219 }
 0x57b   : > { %2766 = vmatprep.subr.mxu0 %v2131_v59 }
 0x57c   : > { %v2867_v38 = vpop.eup %2866  ;;  %2767 = vmatpush3.msra.mxu0 %v2131_v59 }
 0x57d   : > { %v1944_v45 = vmul.f32 %v2867_v38, %v2851_v20 }
 0x57f   : > { %2761 = vmatprep.mubr.msk.f32.mxu1 %vm925_vm5, %v1944_v45 }
 0x580   : > { %v2869_v46 = vpop.eup %2868  ;;  %2762 = vmatmul.mubr.msk.f32.vlgmr.msra.gmra.mxu1 %vm925_vm5, %v1945_v43 }
 0x581   : > { %v2871_v47 = vpop.eup %2870  ;;  %2772 = vmatpush3.msra.mxu1 %v2222_v26  ;;  %v1946_v51 = vmul.f32 %v2869_v46, %v2853_v24 }
 0x582   : > { %2773 = vmatprep.subr.mxu1 %v2220_v48  ;;  %v1947_v49 = vmul.f32 %v2871_v47, %v2855_v25  ;;  %v1355_v47 = vmin.f32 %v3286_v50, 0.0 }
 0x583   : > { %2774 = vmatpush3.msra.mxu1 %v2220_v48  ;;  %2768 = vmatprep.mubr.msk.f32.mxu0 %vm925_vm5, %v1946_v51  ;;  %v1354_v48 = vmin.f32 %v3288_v52, 0.0 }
 0x584   : > { %v2873_v18 = vpop.eup %2872  ;;  %2769 = vmatmul.mubr.msk.f32.vlgmr.msra.gmra.mxu0 %vm925_vm5, %v1947_v49  ;;  %v1364_v51 = vmul.f32 1.442695, %v1355_v47 }
 0x585   : > { %v2875_v56 = vpop.eup %2874  ;;  %v1948_v19 = vmul.f32 %v2873_v18, %v2857_v29  ;;  %v1362_v49 = vmul.f32 1.442695, %v1354_v48  ;;  %v1357_v18 = vmin.f32 %v3290_v14, 0.0 }
 0x586   : > { %v1949_v61 = vmul.f32 %v2875_v56, %v2859_v30  ;;  %v1356_v56 = vmin.f32 %v3294_v16, 0.0 }
 0x587   : > { %2775 = vmatprep.mubr.msk.f32.mxu1 %vm925_vm5, %v1948_v19  ;;  %v1368_v19 = vmul.f32 1.442695, %v1357_v18 }
 0x588   : > { %2776 = vmatmul.mubr.msk.f32.vlgmr.msra.gmra.mxu1 %vm925_vm5, %v1949_v61  ;;  %v1359_v61 = vmin.f32 %v3292_v53, 0.0 }
 0x638   : > { %v2756_v60 = vpop.f32.mrf.mxu0 }
 0x639   : > { %v2315_v55 = vmin.f32 %v2756_v60, 0.0  ;;  %vm2307_vm4 = vcmp.gt.f32.partialorder %v2756_v60, 0.0 }
 0x63a   : > { %v2030_v57 = vpop.f32.mrf.mxu0 }
 0x63b   : > { %v2324_v58 = vmul.f32 1.442695, %v2315_v55  ;;  %v2314_v63 = vmin.f32 %v2030_v57, 0.0  ;;  %vm2306_vm6 = vcmp.gt.f32.partialorder %v2030_v57, 0.0  ;;  %v1358_v55 = vmin.f32 %v3296_v17, 0.0 }
 0x63d   : > { %2876 = vpow2.f32 %v2324_v58  ;;  %v2322_v13 = vmul.f32 1.442695, %v2314_v63  ;;  %v1361_v58 = vmin.f32 %v3298_v54, 0.0  ;;  %v1370_v63 = vmul.f32 1.442695, %v1358_v55 }
 0x63f   : > { %2878 = vpow2.f32 %v2322_v13  ;;  %v1360_v13 = vmin.f32 %v3300_v21, 0.0 }
 0x640   : > { %v2763_v0 = vpop.f32.mrf.mxu1 }
 0x641   : > { %v2317_v2 = vmin.f32 %v2763_v0, 0.0  ;;  %vm2309_vm7 = vcmp.gt.f32.partialorder %v2763_v0, 0.0 }
 0x642   : > { %v2119_v3 = vpop.f32.mrf.mxu1 }
 0x643   : > { %v2328_v4 = vmul.f32 1.442695, %v2317_v2  ;;  %v2316_v12 = vmin.f32 %v2119_v3, 0.0  ;;  %vm2308_vm8 = vcmp.gt.f32.partialorder %v2119_v3, 0.0 }
 0x644   : > { %v2770_v7 = vpop.f32.mrf.mxu0 }
 0x645   : > { %2880 = vpow2.f32 %v2328_v4  ;;  %v2326_v15 = vmul.f32 1.442695, %v2316_v12  ;;  %v2319_v8 = vmin.f32 %v2770_v7, 0.0  ;;  %vm2311_vm9 = vcmp.gt.f32.partialorder %v2770_v7, 0.0 }
 0x646   : > { %v2208_v6 = vpop.f32.mrf.mxu0 }
 0x647   : > { %2882 = vpow2.f32 %v2326_v15  ;;  %v2332_v10 = vmul.f32 1.442695, %v2319_v8  ;;  %v2318_v9 = vmin.f32 %v2208_v6, 0.0  ;;  %vm2310_vm10 = vcmp.gt.f32.partialorder %v2208_v6, 0.0 }
 0x648   : > { %v2777_v11 = vpop.f32.mrf.mxu1 }
 0x649   : > { %2884 = vpow2.f32 %v2332_v10  ;;  %v2330_v20 = vmul.f32 1.442695, %v2318_v9  ;;  %v2321_v22 = vmin.f32 %v2777_v11, 0.0  ;;  %vm2313_vm11 = vcmp.gt.f32.partialorder %v2777_v11, 0.0 }
 0x64a   : > { %v2877_v23 = vpop.eup %2876  ;;  %v2297_v24 = vpop.f32.mrf.mxu1 }
 0x64b   : > { %2886 = vpow2.f32 %v2330_v20  ;;  %v2336_v25 = vmul.f32 1.442695, %v2321_v22  ;;  %v2320_v26 = vmin.f32 %v2297_v24, 0.0  ;;  %v2545_v28 = vadd.f32 -1.0, %v2877_v23 }
 0x64c   : > { %v2879_v27 = vpop.eup %2878  ;;  %vm2312_vm12 = vcmp.gt.f32.partialorder %v2297_v24, 0.0 }
 0x64d   : > { %2888 = vpow2.f32 %v2336_v25  ;;  %v2334_v29 = vmul.f32 1.442695, %v2320_v26  ;;  %v2544_v30 = vadd.f32 -1.0, %v2879_v27  ;;  %v2347_v31 = vsel %vm2307_vm4, %v2756_v60, %v2545_v28 }
 0x64e   : > { %2364 = vrot.lane.b32.xlu1 %v2347_v31, %s2921_s5  ;;  %v1366_v60 = vmul.f32 1.442695, %v1356_v56  ;;  %vm1353_vm4 = vcmp.gt.f32.partialorder %v3298_v54, 0.0 }
 0x64f   : > { %2890 = vpow2.f32 %v2334_v29  ;;  %v2346_v32 = vsel %vm2306_vm6, %v2030_v57, %v2544_v30  ;;  %v1372_v57 = vmul.f32 1.442695, %v1359_v61  ;;  %vm1352_vm6 = vcmp.gt.f32.partialorder %v3300_v21, 0.0 }
 0x650   : > { %2362 = vrot.lane.b32.xlu0 %v2346_v32, %s2921_s5  ;;  %2892 = vpow2.f32 %v1364_v51 }
 0x651   : > { %2894 = vpow2.f32 %v1362_v49 }
 0x652   : > { %v2881_v33 = vpop.eup %2880  ;;  %2896 = vpow2.f32 %v1368_v19 }
 0x653   : > { %v2547_v34 = vadd.f32 -1.0, %v2881_v33  ;;  %2898 = vpow2.f32 %v1366_v60 }
 0x654   : > { %v2883_v35 = vpop.eup %2882  ;;  %2900 = vpow2.f32 %v1372_v57 }
 0x655   : > { %v2349_v36 = vsel %vm2309_vm7, %v2763_v0, %v2547_v34  ;;  %v2546_v37 = vadd.f32 -1.0, %v2883_v35  ;;  %v1376_v0 = vmul.f32 1.442695, %v1361_v58  ;;  %2902 = vpow2.f32 %v1370_v63 }
 0x656   : > { %v2885_v39 = vpop.eup %2884  ;;  %2368 = vrot.lane.b32.xlu1 %v2349_v36, %s2921_s5 }
 0x657   : > { %v2348_v40 = vsel %vm2308_vm8, %v2119_v3, %v2546_v37  ;;  %v2549_v41 = vadd.f32 -1.0, %v2885_v39  ;;  %v1374_v3 = vmul.f32 1.442695, %v1360_v13  ;;  %2904 = vpow2.f32 %v1376_v0 }
 0x658   : > { %v2887_v1 = vpop.eup %2886  ;;  %2366 = vrot.lane.b32.xlu0 %v2348_v40, %s2921_s5 }
 0x659   : > { %v2351_v5 = vsel %vm2311_vm9, %v2770_v7, %v2549_v41  ;;  %v2548_v62 = vadd.f32 -1.0, %v2887_v1  ;;  %2906 = vpow2.f32 %v1374_v3 }
 0x65a   : > { %v2889_v42 = vpop.eup %2888  ;;  %2372 = vrot.lane.b32.xlu1 %v2351_v5, %s2921_s5 }
 0x65b   : > { %v2350_v59 = vsel %vm2310_vm10, %v2208_v6, %v2548_v62  ;;  %v2551_v44 = vadd.f32 -1.0, %v2889_v42 }
 0x65c   : > { %v2891_v38 = vpop.eup %2890  ;;  %2370 = vrot.lane.b32.xlu0 %v2350_v59, %s2921_s5 }
 0x65d   : > { %v2353_v45 = vsel %vm2313_vm11, %v2777_v11, %v2551_v44  ;;  %v2550_v43 = vadd.f32 -1.0, %v2891_v38  ;;  %v2893_v2 = vpop.eup %2892 }
 0x65e   : > { %2376 = vrot.lane.b32.xlu1 %v2353_v45, %s2921_s5  ;;  %v2895_v4 = vpop.eup %2894  ;;  %v2513_v12 = vadd.f32 -1.0, %v2893_v2 }
 0x65f   : > { %v2352_v46 = vsel %vm2312_vm12, %v2297_v24, %v2550_v43  ;;  %v2512_v7 = vadd.f32 -1.0, %v2895_v4  ;;  %v2897_v15 = vpop.eup %2896 }
 0x660   : > { %2374 = vrot.lane.b32.xlu0 %v2352_v46, %s2921_s5  ;;  %v1387_v8 = vsel %vm1347_vm13, %v3286_v50, %v2513_v12  ;;  %v2899_v20 = vpop.eup %2898  ;;  %v2515_v23 = vadd.f32 -1.0, %v2897_v15 }
 0x661   : > { %v1386_v10 = vsel %vm1346_vm15, %v3288_v52, %v2512_v7  ;;  %v2901_v24 = vpop.eup %2900  ;;  %v2514_v25 = vadd.f32 -1.0, %v2899_v20 }
 0x662   : > { %v2903_v50 = vpop.eup %2902  ;;  %v1389_v52 = vsel %vm1349_vm0, %v3290_v14, %v2515_v23  ;;  %v2517_v26 = vadd.f32 -1.0, %v2901_v24 }
 0x663   : > { %v1388_v30 = vsel %vm1348_vm1, %v3294_v16, %v2514_v25  ;;  %v2516_v31 = vadd.f32 -1.0, %v2903_v50 }
 0x664   : > { %v2905_v28 = vpop.eup %2904  ;;  %v1391_v34 = vsel %vm1351_vm2, %v3292_v53, %v2517_v26 }
 0x665   : > { %v2519_v35 = vadd.f32 -1.0, %v2905_v28  ;;  %v1390_v37 = vsel %vm1350_vm3, %v3296_v17, %v2516_v31 }
 0x666   : > { %v2907_v33 = vpop.eup %2906 }
 0x667   : > { %v2518_v39 = vadd.f32 -1.0, %v2907_v33  ;;  %v1393_v41 = vsel %vm1353_vm4, %v3298_v54, %v2519_v35 }
 0x669   : > { %v1392_v62 = vsel %vm1352_vm6, %v3300_v21, %v2518_v39 }
 0x6c0   : > { %v2365_v6 = vpop.permute.xlu1 %2364 }
 0x6c1   : > { %v2387_v9 = vsel %vm925_vm5, %v1387_v8, %v2365_v6 }
 0x6c2   : > { %v2363_v11 = vpop.permute.xlu0 %2362  ;;  %2396 = vst.msk [vmem:[%s3375_s8 + $0x8] sm:$0xff] %vm2394_vm14, %v2387_v9 }
 0x6c3   : > { %v2386_v22 = vsel %vm925_vm5, %v1386_v10, %v2363_v11 }
 0x6c4   : > { %2395 = vst.msk [vmem:[%s3375_s8] sm:$0xff] %vm2394_vm14, %v2386_v22 }
 0x6c8   : > { %v2369_v27 = vpop.permute.xlu1 %2368 }
 0x6c9   : > { %v2389_v29 = vsel %vm925_vm5, %v1389_v52, %v2369_v27 }
 0x6ca   : > { %2398 = vst.msk [vmem:[%s3375_s8 + $0x18] sm:$0xff] %vm2394_vm14, %v2389_v29  ;;  %v2367_v32 = vpop.permute.xlu0 %2366 }
 0x6cb   : > { %v2388_v14 = vsel %vm925_vm5, %v1388_v30, %v2367_v32 }
 0x6cc   : > { %2397 = vst.msk [vmem:[%s3375_s8 + $0x10] sm:$0xff] %vm2394_vm14, %v2388_v14  ;;  %v2373_v36 = vpop.permute.xlu1 %2372 }
 0x6cd   : > { %v2391_v16 = vsel %vm925_vm5, %v1391_v34, %v2373_v36 }
 0x6ce   : > { %2400 = vst.msk [vmem:[%s3375_s8 + $0x28] sm:$0xff] %vm2394_vm14, %v2391_v16  ;;  %v2371_v40 = vpop.permute.xlu0 %2370 }
 0x6cf   : > { %v2390_v53 = vsel %vm925_vm5, %v1390_v37, %v2371_v40 }
 0x6d0   : > { %2399 = vst.msk [vmem:[%s3375_s8 + $0x20] sm:$0xff] %vm2394_vm14, %v2390_v53  ;;  %v2377_v1 = vpop.permute.xlu1 %2376 }
 0x6d1   : > { %v2393_v5 = vsel %vm925_vm5, %v1393_v41, %v2377_v1 }
 0x6d2   : > { %2402 = vst.msk [vmem:[%s3375_s8 + $0x38] sm:$0xff] %vm2394_vm14, %v2393_v5  ;;  %v2375_v17 = vpop.permute.xlu0 %2374 }
 0x6d3   : > { %v2392_v42 = vsel %vm925_vm5, %v1392_v62, %v2375_v17 }
 0x6d4   : > { %2401 = vst.msk [vmem:[%s3375_s8 + $0x30] sm:$0xff] %vm2394_vm14, %v2392_v42 }
 0x6d5 PF: > { %s14_s15 = sadd.s32 1, %s2914_s15  }
 0x6d6   : > { %p11_p4 = scmp.ge.s32.totalorder %s14_s15, 4  }
 0x6d8   :  { %13 = sbr.rel (!%p11_p4) target bundleno = 1 (0x1), region = 66 }

</bundles_post_ra>
